<compile_context>
chip_gen: v6e
topology: v6e:2x2x1
jax: 0.10.0
libtpu: 0.0.40
codegen_flags: <defaults>
</compile_context>

<pallas_src>
import numpy as np
import jax
import jax.numpy as jnp
from jax.experimental import pallas as pl
from jax.experimental.pallas import tpu as pltpu

MXU_DT = jnp.bfloat16   # matmul input dtype (f32 accumulation everywhere)


# ============================================================================
# Static plan: every shape / padding / tap offset is a compile-time constant.
# ============================================================================
def make_plan(cfg):
    depth = cfg["depth"]
    filters = cfg["filters"]
    filters = list(filters) if isinstance(filters, (list, tuple)) else \
        [int(filters * 2 ** i) for i in range(depth)]
    kernels = cfg["kernels"]
    kernels = list(kernels) if isinstance(kernels, (list, tuple)) else [kernels] * depth
    poolings = cfg["poolings"]
    poolings = list(poolings) if isinstance(poolings, (list, tuple)) else \
        [poolings] * (depth - 1)

    sizes = [cfg["n_time"]]
    nbcs = [cfg["nb_channels_spectro"]]
    for i in range(depth - 1):
        sizes.append(sizes[-1] // poolings[i])
        nbcs.append(nbcs[-1] // poolings[i])

    def plo(k):                       # PyTorch 'same' left/top pad
        return (k - 1) // 2

    # ---------------- moments (1D, H == 1) encoder ----------------
    m_layers = []
    for i in range(depth):
        kw = kernels[i]
        kh = 1 if i < depth - 1 else kernels[-1]     # last layer is (k, k) on H == 1
        cin = cfg["nb_moments"] if i == 0 else filters[i - 1]
        m_layers.append(dict(W=sizes[i], KW=kw, KH=kh, cin=cin, cout=filters[i],
                             pl=plo(kw), pr=kw - 1 - plo(kw)))

    # ---------------- spectro (2D) encoder: flat row-major (h, w) slabs ----------
    s_layers = []
    for i in range(depth):
        h, w = nbcs[i], sizes[i]
        kh, kw = min(kernels[i], nbcs[i]), kernels[i]
        hp, wp = h + kh - 1, w + kw - 1
        cin = 1 if i == 0 else filters[i - 1]
        s_layers.append(dict(H=h, W=w, KH=kh, KW=kw, Hp=hp, Wp=wp,
                             Lin=hp * wp + (kw - 1), Lslab=h * wp,
                             ph=plo(kh), pw=plo(kw), cin=cin, cout=filters[i],
                             offs=[r * wp + c for r in range(kh) for c in range(kw)]))

    # stride-p column-select matrices (tiny, bf16, shared by both branches)
    pools = []
    for i in range(depth - 1):
        p = poolings[i]
        w2 = sizes[i + 1]
        lsel = p * (w2 - 1) + 1
        d = np.zeros((lsel, w2), np.float32)
        for j in range(w2):
            d[p * j, j] = 1.0
        pools.append(dict(p=p, W2=w2, Lsel=lsel, D=d))

    # bottleneck / decoder / classifier
    kb = kernels[-1]
    bneck = dict(W=sizes[-1], K=kb, F=filters[-1], pl=plo(kb), pr=kb - 1 - plo(kb))

    dec = []
    for j in range(1, depth):
        k = kernels[-j]
        w_out, w_in = sizes[depth - 1 - j], sizes[depth - j]
        up = np.zeros((w_in, w_out), np.float32)      # nearest upsample (floor rule)
        for w in range(w_out):
            up[(w * w_in) // w_out, w] = 1.0
        dec.append(dict(K=k, W=w_out, Win=w_in, pl=plo(k), pr=k - 1 - plo(k),
                        cx=filters[-j], cs=filters[-j - 1], cout=filters[-j - 1],
                        enc_level=depth - 1 - j, up=up))

    return dict(depth=depth, filters=filters, kernels=kernels, poolings=poolings,
                sizes=sizes, nbcs=nbcs, nb_moments=cfg["nb_moments"],
                n_classes=cfg["n_classes"],
                m_layers=m_layers, s_layers=s_layers, pools=pools,
                bneck=bneck, dec=dec)


# ============================================================================
# Parameter init (PyTorch-like) + BN folding + kernel-ready (tap-stacked) layout
# ============================================================================
def _conv_init(key, cin, cout, kh, kw):
    k1, k2 = jax.random.split(key)
    bound = 1.0 / float(cin * kh * kw) ** 0.5
    w = jax.random.uniform(k1, (cout, cin, kh, kw), jnp.float32, -bound, bound)
    b = jax.random.uniform(k2, (cout,), jnp.float32, -bound, bound)
    return w, b


def _bn_init(key, c, eps=1e-5):
    k1, k2, k3, k4 = jax.random.split(key, 4)
    gamma = 1.0 + 0.1 * jax.random.normal(k1, (c,), jnp.float32)
    beta = 0.1 * jax.random.normal(k2, (c,), jnp.float32)
    rmean = 0.1 * jax.random.normal(k3, (c,), jnp.float32)
    rvar = 1.0 + 0.1 * jnp.abs(jax.random.normal(k4, (c,), jnp.float32))
    return (gamma, beta, rmean, rvar, eps)


def _fold(w, b, bn):
    """Inference-mode BatchNorm folded into the conv: y = conv(x, w') + shift."""
    if bn is None:
        return w, b
    gamma, beta, rmean, rvar, eps = bn
    scale = gamma / jnp.sqrt(rvar + eps)
    return w * scale[:, None, None, None], b * scale + beta - rmean * scale


def _stack_w(w, kh_rows):
    """(Cout, Cin, KH, KW) -> (Cout, len(kh_rows)*KW*Cin) in the kernel's
    tap-major / Cin-minor stacked-operand order."""
    cout, cin, kh, kw = w.shape
    wsel = w[:, :, kh_rows, :]                        # (Cout, Cin, nKH, KW)
    return jnp.transpose(wsel, (0, 2, 3, 1)).reshape(cout, len(kh_rows) * kw * cin)


def init_utime_operands(key, plan):
    """Flat operand tuple for the fused kernel.  ORDER MUST MATCH _make_kernel."""
    depth, filters = plan["depth"], plan["filters"]
    keys = iter(jax.random.split(key, 8 * depth + 16))
    ops = []

    # 1) moments encoder convs: (stacked taps bf16, shift f32) per layer
    for i in range(depth):
        L = plan["m_layers"][i]
        w, b = _conv_init(next(keys), L["cin"], L["cout"], L["KH"], L["KW"])
        w, b = _fold(w, b, _bn_init(next(keys), L["cout"]))
        # H == 1 with 'same' padding -> only the centre KH row contributes
        ops.append(_stack_w(w, [(L["KH"] - 1) // 2]).astype(MXU_DT))
        ops.append(b.reshape(-1, 1).astype(jnp.float32))

    # 2) spectro encoder convs
    for i in range(depth):
        L = plan["s_layers"][i]
        w, b = _conv_init(next(keys), L["cin"], L["cout"], L["KH"], L["KW"])
        w, b = _fold(w, b, _bn_init(next(keys), L["cout"]))
        ops.append(_stack_w(w, list(range(L["KH"]))).astype(MXU_DT))
        ops.append(b.reshape(-1, 1).astype(jnp.float32))

    # 3) stride-p column-select matrices (one per pooled level, bf16 one-hot)
    for P in plan["pools"]:
        ops.append(jnp.asarray(P["D"]).astype(MXU_DT))

    # 4) bottleneck conv (no BN, no ReLU).
    # TODO(synk): PyTorch builds a *fresh* randomly-initialised float64 Conv2d at
    # every forward call here; we use a fixed float32/bf16 parameter instead.
    bn = plan["bneck"]
    wb, bb = _conv_init(next(keys), 2 * bn["F"], bn["F"], 1, bn["K"])
    ops.append(_stack_w(wb, [0]).astype(MXU_DT))
    ops.append(bb.reshape(-1, 1).astype(jnp.float32))

    # 5) decoder levels: (nearest-upsample one-hot, fused conv weight, shift)
    for d in plan["dec"]:
        w, b = _conv_init(next(keys), d["cx"] + 2 * d["cs"], d["cout"], 1, d["K"])
        w, b = _fold(w, b, _bn_init(next(keys), d["cout"]))
        ops.append(jnp.asarray(d["up"]).astype(MXU_DT))
        ops.append(_stack_w(w, [0]).astype(MXU_DT))
        ops.append(b.reshape(-1, 1).astype(jnp.float32))

    # 6) classifier (1x1 conv + BN folded), bf16 weight, f32 shift
    wc, bc = _conv_init(next(keys), filters[0], plan["n_classes"], 1, 1)
    wc, bc = _fold(wc, bc, _bn_init(next(keys), plan["n_classes"]))
    ops.append(wc[:, :, 0, 0].astype(MXU_DT))          # (n_classes, filters[0])
    ops.append(bc.reshape(-1, 1).astype(jnp.float32))

    return tuple(ops)


# ============================================================================
# The fused kernel (one program per batch element)
# ============================================================================
def _make_kernel(plan):
    depth = plan["depth"]
    n_classes = plan["n_classes"]
    f32 = jnp.float32

    def pad_w(x, left, right):
        """Zero-pad along the lane (time) axis via concatenation."""
        parts = []
        if left:
            parts.append(jnp.zeros((x.shape[0], left), x.dtype))
        parts.append(x)
        if right:
            parts.append(jnp.zeros((x.shape[0], right), x.dtype))
        return parts[0] if len(parts) == 1 else jnp.concatenate(parts, axis=1)

    def conv(xpad, w_ref, s_ref, n_out, offs, relu=True):
        """Tap-stacked conv: ONE MXU matmul with K = len(offs) * Cin.
        xpad : (Cin, >= max(offs)+n_out) zero-padded f32 input.
        w_ref: (Cout, len(offs)*Cin) bf16, tap-major / Cin-minor."""
        xstk = jnp.concatenate([xpad[:, o:o + n_out] for o in offs], axis=0)
        y = jnp.dot(w_ref[...], xstk.astype(MXU_DT),
                    preferred_element_type=f32) + s_ref[...]
        return jnp.maximum(y, 0.0) if relu else y

    def maxpool_w(x, p, w2, dsel_ref):
        """(C, >=p*w2) -> (C, w2): window/stride-p max along lanes.
        VPU phase max over shifted slices + one bf16 one-hot stride select."""
        lsel = p * (w2 - 1) + 1
        y = x[:, 0:lsel]
        for a in range(1, p):
            y = jnp.maximum(y, x[:, a:a + lsel])
        return jnp.dot(y.astype(MXU_DT), dsel_ref[...], preferred_element_type=f32)

    def mean_h(act, L):
        """(C, H*Wp) flat slab -> (C, W): exact mean over H (VPU slice-sum)."""
        s = act[:, 0:L["W"]]
        for h in range(1, L["H"]):
            s = s + act[:, h * L["Wp"]: h * L["Wp"] + L["W"]]
        return s * (1.0 / L["H"])

    def pool2d_to_next(act, Lc, Ln, p, dsel_ref):
        """(p, p) MaxPool of the current flat slab, placed straight into the
        next level's zero-padded flat slab (C, Ln['Lin'])."""
        C = act.shape[0]
        H2, W2, Wp = Ln["H"], Ln["W"], Lc["Wp"]
        wrow = p * W2
        lead = Ln["ph"] * Ln["Wp"] + Ln["pw"]
        gap = Ln["KW"] - 1
        tail = (Ln["KH"] - 1 - Ln["ph"]) * Ln["Wp"] \
            + (Ln["KW"] - 1 - Ln["pw"]) + (Ln["KW"] - 1)
        pieces = []
        if lead:
            pieces.append(jnp.zeros((C, lead), f32))
        for h2 in range(H2):
            row = act[:, (p * h2) * Wp: (p * h2) * Wp + wrow]
            for a in range(1, p):                       # H-phase max (VPU)
                off = (p * h2 + a) * Wp
                row = jnp.maximum(row, act[:, off: off + wrow])
            if h2 > 0 and gap:
                pieces.append(jnp.zeros((C, gap), f32))
            pieces.append(maxpool_w(row, p, W2, dsel_ref))
        if tail:
            pieces.append(jnp.zeros((C, tail), f32))
        return jnp.concatenate(pieces, axis=1)

    def kernel(*refs):
        out_ref = refs[-1]
        it = iter(refs[:-1])
        nxt = lambda: next(it)

        # --- unpack (order matches init_utime_operands) ---
        xm_ref = nxt()
        xs_ref = nxt()
        wm = [(nxt(), nxt()) for _ in range(depth)]
        ws = [(nxt(), nxt()) for _ in range(depth)]
        dsel = [nxt() for _ in range(depth - 1)]
        wb_ref, sb_ref = nxt(), nxt()
        dec_refs = [(nxt(), nxt(), nxt()) for _ in range(depth - 1)]
        wc_ref, sc_ref = nxt(), nxt()

        # ------------------- moments (1D, H == 1) encoder -------------------
        cur = xm_ref[0]                                   # (nb_moments, n_time)
        m_skips, mom_out = [], None
        for i in range(depth):
            L = plan["m_layers"][i]
            act = conv(pad_w(cur, L["pl"], L["pr"]), wm[i][0], wm[i][1],
                       L["W"], list(range(L["KW"])))
            if i < depth - 1:
                m_skips.append(act)                       # post-ReLU, pre-pool
                P = plan["pools"][i]
                cur = maxpool_w(act, P["p"], P["W2"], dsel[i])
            else:
                mom_out = act                             # (filters[-1], sizes[-1])

        # ------------------- spectro (2D) encoder (flat slabs) -------------------
        cur = xs_ref[0]                                   # (1, Lin0), pre-padded
        s_skips, spec_out = [], None
        for i in range(depth):
            L = plan["s_layers"][i]
            act = conv(cur, ws[i][0], ws[i][1], L["Lslab"], L["offs"])
            if i < depth - 1:
                s_skips.append(mean_h(act, L))            # mean over H of pre-pool act
                P = plan["pools"][i]
                cur = pool2d_to_next(act, L, plan["s_layers"][i + 1], P["p"], dsel[i])
            else:
                spec_out = mean_h(act, L)                 # (filters[-1], sizes[-1])

        # ------------- bottleneck: channel concat -> single conv (no BN/ReLU) -------
        bn = plan["bneck"]
        xcat = jnp.concatenate([spec_out, mom_out], axis=0)     # (2F, W)
        x = conv(pad_w(xcat, bn["pl"], bn["pr"]), wb_ref, sb_ref,
                 bn["W"], list(range(bn["K"])), relu=False)

        # ------------------- decoder: upsample + skip concat -> fused conv ----------
        for j, d in enumerate(plan["dec"]):
            U_ref, dw_ref, dsft_ref = dec_refs[j]
            up = jnp.dot(x.astype(MXU_DT), U_ref[...], preferred_element_type=f32)
            lvl = d["enc_level"]
            xcat = jnp.concatenate([up, s_skips[lvl], m_skips[lvl]], axis=0)
            x = conv(pad_w(xcat, d["pl"], d["pr"]), dw_ref, dsft_ref,
                     d["W"], list(range(d["K"])))

        # ------------------- classifier head (lane-dense output) -------------------
        logits = jnp.dot(wc_ref[...], x.astype(MXU_DT),
                         preferred_element_type=f32) + sc_ref[...]
        if n_classes == 1:
            out = pl.reciprocal(1.0 + jnp.exp(-logits), approx=True)
        else:
            mx = jnp.max(logits, axis=0, keepdims=True)
            ex = jnp.exp(logits - mx)
            out = ex * pl.reciprocal(jnp.sum(ex, axis=0, keepdims=True), approx=True)
        out_ref[0] = out.astype(out_ref.dtype)            # (n_classes, n_time)

    return kernel


# ============================================================================
# Forward-pass wrapper
# ============================================================================
def make_forward(plan):
    n_time = plan["sizes"][0]
    n_classes = plan["n_classes"]
    kernel = _make_kernel(plan)

    def fwd(ops, moments, spectro):
        B = moments.shape[0]

        # moments (B, C, 1, T) -> (B, C, T): NCHW is already channel-major
        xm = moments[:, :, 0, :].astype(jnp.float32)

        # spectro (B, 1, H, T) -> zero-padded flat row-major slab (B, 1, Lin0)
        s0 = plan["s_layers"][0]
        sp = spectro[:, 0].astype(jnp.float32)
        sp = jnp.pad(sp, ((0, 0),
                          (s0["ph"], s0["KH"] - 1 - s0["ph"]),
                          (s0["pw"], s0["KW"] - 1 - s0["pw"])))    # (B, Hp, Wp)
        sp = sp.reshape(B, s0["Hp"] * s0["Wp"])
        sp = jnp.pad(sp, ((0, 0), (0, s0["Lin"] - s0["Hp"] * s0["Wp"])))
        xs = sp[:, None, :]                                        # (B, 1, Lin0)

        def sample_spec(arr):       # one batch element per grid step
            nd = arr.ndim
            return pl.BlockSpec((1,) + arr.shape[1:],
                                lambda b, _nd=nd: (b,) + (0,) * (_nd - 1))

        def const_spec(arr):        # whole array, same block every step
            nd = arr.ndim
            return pl.BlockSpec(arr.shape, lambda b, _nd=nd: (0,) * _nd)

        in_specs = [sample_spec(xm), sample_spec(xs)] + [const_spec(a) for a in ops]

        # Explicit VMEM budget: constants are double-buffered by default, so audit
        # them with headroom; cap at 56 MiB (v7x has 64 MiB physical per TC).
        op_bytes = sum(int(np.prod(a.shape)) * a.dtype.itemsize for a in ops)
        io_bytes = (int(np.prod(xm.shape[1:])) + int(np.prod(xs.shape[1:]))
                    + n_classes * n_time) * 4
        vmem_limit = int(min(56 * 2 ** 20,
                             max(32 * 2 ** 20, 4 * (op_bytes + io_bytes) + 8 * 2 ** 20)))

        out = pl.pallas_call(
            kernel,
            out_shape=jax.ShapeDtypeStruct((B, n_classes, n_time), jnp.float32),
            grid=(B,),
            in_specs=in_specs,
            out_specs=pl.BlockSpec((1, n_classes, n_time), lambda b: (b, 0, 0)),
            compiler_params=pltpu.CompilerParams(
                dimension_semantics=("parallel",),     # 2nd TensorCore on v7x
                vmem_limit_bytes=vmem_limit),
        )(xm, xs, *ops)

        # (B, n_classes, n_time) -> (B, n_classes, 1, n_time): pure reshape (no transpose)
        return out[:, :, None, :]

    return fwd


# ============================================================================
if __name__ == "__main__":
    cfg = dict(n_classes=3, n_time=16, nb_moments=4, nb_channels_spectro=12,
               depth=3, filters=4, kernels=3, poolings=2, batch=2)

    plan = make_plan(cfg)

    key = jax.random.PRNGKey(0)
    pkey, mkey, skey = jax.random.split(key, 3)
    ops = init_utime_operands(pkey, plan)

    moments = jax.random.normal(
        mkey, (cfg["batch"], cfg["nb_moments"], 1, cfg["n_time"]), jnp.float32)
    spectro = jax.random.normal(
        skey, (cfg["batch"], 1, cfg["nb_channels_spectro"], cfg["n_time"]), jnp.float32)

    fwd = jax.jit(make_forward(plan))
    out = jax.block_until_ready(fwd(ops, moments, spectro))

    assert out.shape == (cfg["batch"], cfg["n_classes"], 1, cfg["n_time"]), out.shape
    # softmax over the channel dim (dim=1) must sum to ~1 (approx reciprocal -> loose tol)
    chan_sums = jnp.sum(out, axis=1)
    assert bool(jnp.allclose(chan_sums, 1.0, atol=1e-2)), "softmax check failed"
    print("KERNEL_OK")
</pallas_src>

<mosaic_0001>
module attributes {stable_mosaic.version = 11 : i64} {
  func.func @kernel(%arg0: i32, %arg1: memref<1x4x16xf32, #tpu.memory_space<vmem>>, %arg2: memref<1x1x254xf32, #tpu.memory_space<vmem>>, %arg3: memref<4x12xbf16, #tpu.memory_space<vmem>>, %arg4: memref<4x1xf32, #tpu.memory_space<vmem>>, %arg5: memref<8x12xbf16, #tpu.memory_space<vmem>>, %arg6: memref<8x1xf32, #tpu.memory_space<vmem>>, %arg7: memref<16x24xbf16, #tpu.memory_space<vmem>>, %arg8: memref<16x1xf32, #tpu.memory_space<vmem>>, %arg9: memref<4x9xbf16, #tpu.memory_space<vmem>>, %arg10: memref<4x1xf32, #tpu.memory_space<vmem>>, %arg11: memref<8x36xbf16, #tpu.memory_space<vmem>>, %arg12: memref<8x1xf32, #tpu.memory_space<vmem>>, %arg13: memref<16x72xbf16, #tpu.memory_space<vmem>>, %arg14: memref<16x1xf32, #tpu.memory_space<vmem>>, %arg15: memref<15x8xbf16, #tpu.memory_space<vmem>>, %arg16: memref<7x4xbf16, #tpu.memory_space<vmem>>, %arg17: memref<16x96xbf16, #tpu.memory_space<vmem>>, %arg18: memref<16x1xf32, #tpu.memory_space<vmem>>, %arg19: memref<4x8xbf16, #tpu.memory_space<vmem>>, %arg20: memref<8x96xbf16, #tpu.memory_space<vmem>>, %arg21: memref<8x1xf32, #tpu.memory_space<vmem>>, %arg22: memref<8x16xbf16, #tpu.memory_space<vmem>>, %arg23: memref<4x48xbf16, #tpu.memory_space<vmem>>, %arg24: memref<4x1xf32, #tpu.memory_space<vmem>>, %arg25: memref<3x4xbf16, #tpu.memory_space<vmem>>, %arg26: memref<3x1xf32, #tpu.memory_space<vmem>>, %arg27: memref<1x3x16xf32, #tpu.memory_space<vmem>>) attributes {dimension_semantics = [#tpu.dimension_semantics<parallel>], iteration_bounds = array<i64: 2>, scalar_prefetch = 0 : i64, scratch_operands = 0 : i64, tpu.core_type = #tpu.core_type<tc>, window_params = [{transform_indices = @transform_0, window_bounds = array<i64: 1, 4, 16>}, {transform_indices = @transform_1, window_bounds = array<i64: 1, 1, 254>}, {pipeline_mode = #tpu.pipeline_mode<synchronous>, transform_indices = @transform_2, window_bounds = array<i64: 4, 12>}, {pipeline_mode = #tpu.pipeline_mode<synchronous>, transform_indices = @transform_3, window_bounds = array<i64: 4, 1>}, {pipeline_mode = #tpu.pipeline_mode<synchronous>, transform_indices = @transform_4, window_bounds = array<i64: 8, 12>}, {pipeline_mode = #tpu.pipeline_mode<synchronous>, transform_indices = @transform_5, window_bounds = array<i64: 8, 1>}, {pipeline_mode = #tpu.pipeline_mode<synchronous>, transform_indices = @transform_6, window_bounds = array<i64: 16, 24>}, {pipeline_mode = #tpu.pipeline_mode<synchronous>, transform_indices = @transform_7, window_bounds = array<i64: 16, 1>}, {pipeline_mode = #tpu.pipeline_mode<synchronous>, transform_indices = @transform_8, window_bounds = array<i64: 4, 9>}, {pipeline_mode = #tpu.pipeline_mode<synchronous>, transform_indices = @transform_9, window_bounds = array<i64: 4, 1>}, {pipeline_mode = #tpu.pipeline_mode<synchronous>, transform_indices = @transform_10, window_bounds = array<i64: 8, 36>}, {pipeline_mode = #tpu.pipeline_mode<synchronous>, transform_indices = @transform_11, window_bounds = array<i64: 8, 1>}, {pipeline_mode = #tpu.pipeline_mode<synchronous>, transform_indices = @transform_12, window_bounds = array<i64: 16, 72>}, {pipeline_mode = #tpu.pipeline_mode<synchronous>, transform_indices = @transform_13, window_bounds = array<i64: 16, 1>}, {pipeline_mode = #tpu.pipeline_mode<synchronous>, transform_indices = @transform_14, window_bounds = array<i64: 15, 8>}, {pipeline_mode = #tpu.pipeline_mode<synchronous>, transform_indices = @transform_15, window_bounds = array<i64: 7, 4>}, {pipeline_mode = #tpu.pipeline_mode<synchronous>, transform_indices = @transform_16, window_bounds = array<i64: 16, 96>}, {pipeline_mode = #tpu.pipeline_mode<synchronous>, transform_indices = @transform_17, window_bounds = array<i64: 16, 1>}, {pipeline_mode = #tpu.pipeline_mode<synchronous>, transform_indices = @transform_18, window_bounds = array<i64: 4, 8>}, {pipeline_mode = #tpu.pipeline_mode<synchronous>, transform_indices = @transform_19, window_bounds = array<i64: 8, 96>}, {pipeline_mode = #tpu.pipeline_mode<synchronous>, transform_indices = @transform_20, window_bounds = array<i64: 8, 1>}, {pipeline_mode = #tpu.pipeline_mode<synchronous>, transform_indices = @transform_21, window_bounds = array<i64: 8, 16>}, {pipeline_mode = #tpu.pipeline_mode<synchronous>, transform_indices = @transform_22, window_bounds = array<i64: 4, 48>}, {pipeline_mode = #tpu.pipeline_mode<synchronous>, transform_indices = @transform_23, window_bounds = array<i64: 4, 1>}, {pipeline_mode = #tpu.pipeline_mode<synchronous>, transform_indices = @transform_24, window_bounds = array<i64: 3, 4>}, {pipeline_mode = #tpu.pipeline_mode<synchronous>, transform_indices = @transform_25, window_bounds = array<i64: 3, 1>}, {transform_indices = @transform_26, window_bounds = array<i64: 1, 3, 16>}]} {
    %c0 = arith.constant 0 : index
    %c0_0 = arith.constant 0 : index
    %c0_1 = arith.constant 0 : index
    %0 = vector.load %arg1[%c0, %c0_0, %c0_1] : memref<1x4x16xf32, #tpu.memory_space<vmem>>, vector<1x4x16xf32>
    %1 = vector.shape_cast %0 : vector<1x4x16xf32> to vector<4x16xf32>
    %cst = arith.constant 0.000000e+00 : f32
    %2 = vector.broadcast %cst : f32 to vector<4x1xf32>
    %cst_2 = arith.constant 0.000000e+00 : f32
    %3 = vector.broadcast %cst_2 : f32 to vector<4x1xf32>
    %4 = tpu.concatenate %2, %1, %3 in 1 : vector<4x1xf32>, vector<4x16xf32>, vector<4x1xf32> -> vector<4x18xf32>
    %5 = vector.extract_strided_slice %4 {offsets = [0, 0], sizes = [4, 16], strides = [1, 1]} : vector<4x18xf32> to vector<4x16xf32>
    %6 = vector.extract_strided_slice %4 {offsets = [0, 1], sizes = [4, 16], strides = [1, 1]} : vector<4x18xf32> to vector<4x16xf32>
    %7 = vector.extract_strided_slice %4 {offsets = [0, 2], sizes = [4, 16], strides = [1, 1]} : vector<4x18xf32> to vector<4x16xf32>
    %8 = tpu.concatenate %5, %6, %7 in 0 : vector<4x16xf32>, vector<4x16xf32>, vector<4x16xf32> -> vector<12x16xf32>
    %c0_3 = arith.constant 0 : index
    %c0_4 = arith.constant 0 : index
    %9 = vector.load %arg3[%c0_3, %c0_4] : memref<4x12xbf16, #tpu.memory_space<vmem>>, vector<4x12xbf16>
    %10 = arith.truncf %8 : vector<12x16xf32> to vector<12x16xbf16>
    %cst_5 = arith.constant dense<0.000000e+00> : vector<4x16xf32>
    %11 = tpu.matmul %9, %10, %cst_5 {dimension_numbers = #tpu.dot_dimension_numbers<[1], [0], [0], [1], [0, 0, 1, 1], [], []>} : vector<4x12xbf16>, vector<12x16xbf16>, vector<4x16xf32> -> vector<4x16xf32>
    %c0_6 = arith.constant 0 : index
    %c0_7 = arith.constant 0 : index
    %12 = vector.load %arg4[%c0_6, %c0_7] : memref<4x1xf32, #tpu.memory_space<vmem>>, vector<4x1xf32>
    %13 = vector.broadcast %12 : vector<4x1xf32> to vector<4x16xf32>
    %14 = arith.addf %11, %13 : vector<4x16xf32>
    %cst_8 = arith.constant 0.000000e+00 : f32
    %15 = vector.broadcast %cst_8 : f32 to vector<4x16xf32>
    %16 = arith.maximumf %14, %15 : vector<4x16xf32>
    %17 = vector.extract_strided_slice %16 {offsets = [0, 0], sizes = [4, 15], strides = [1, 1]} : vector<4x16xf32> to vector<4x15xf32>
    %18 = vector.extract_strided_slice %16 {offsets = [0, 1], sizes = [4, 15], strides = [1, 1]} : vector<4x16xf32> to vector<4x15xf32>
    %19 = arith.maximumf %17, %18 : vector<4x15xf32>
    %20 = arith.truncf %19 : vector<4x15xf32> to vector<4x15xbf16>
    %c0_9 = arith.constant 0 : index
    %c0_10 = arith.constant 0 : index
    %21 = vector.load %arg15[%c0_9, %c0_10] : memref<15x8xbf16, #tpu.memory_space<vmem>>, vector<15x8xbf16>
    %cst_11 = arith.constant dense<0.000000e+00> : vector<4x8xf32>
    %22 = tpu.matmul %20, %21, %cst_11 {dimension_numbers = #tpu.dot_dimension_numbers<[1], [0], [0], [1], [0, 0, 1, 1], [], []>} : vector<4x15xbf16>, vector<15x8xbf16>, vector<4x8xf32> -> vector<4x8xf32>
    %cst_12 = arith.constant 0.000000e+00 : f32
    %23 = vector.broadcast %cst_12 : f32 to vector<4x1xf32>
    %cst_13 = arith.constant 0.000000e+00 : f32
    %24 = vector.broadcast %cst_13 : f32 to vector<4x1xf32>
    %25 = tpu.concatenate %23, %22, %24 in 1 : vector<4x1xf32>, vector<4x8xf32>, vector<4x1xf32> -> vector<4x10xf32>
    %26 = vector.extract_strided_slice %25 {offsets = [0, 0], sizes = [4, 8], strides = [1, 1]} : vector<4x10xf32> to vector<4x8xf32>
    %27 = vector.extract_strided_slice %25 {offsets = [0, 1], sizes = [4, 8], strides = [1, 1]} : vector<4x10xf32> to vector<4x8xf32>
    %28 = vector.extract_strided_slice %25 {offsets = [0, 2], sizes = [4, 8], strides = [1, 1]} : vector<4x10xf32> to vector<4x8xf32>
    %29 = tpu.concatenate %26, %27, %28 in 0 : vector<4x8xf32>, vector<4x8xf32>, vector<4x8xf32> -> vector<12x8xf32>
    %c0_14 = arith.constant 0 : index
    %c0_15 = arith.constant 0 : index
    %30 = vector.load %arg5[%c0_14, %c0_15] : memref<8x12xbf16, #tpu.memory_space<vmem>>, vector<8x12xbf16>
    %31 = arith.truncf %29 : vector<12x8xf32> to vector<12x8xbf16>
    %cst_16 = arith.constant dense<0.000000e+00> : vector<8x8xf32>
    %32 = tpu.matmul %30, %31, %cst_16 {dimension_numbers = #tpu.dot_dimension_numbers<[1], [0], [0], [1], [0, 0, 1, 1], [], []>} : vector<8x12xbf16>, vector<12x8xbf16>, vector<8x8xf32> -> vector<8x8xf32>
    %c0_17 = arith.constant 0 : index
    %c0_18 = arith.constant 0 : index
    %33 = vector.load %arg6[%c0_17, %c0_18] : memref<8x1xf32, #tpu.memory_space<vmem>>, vector<8x1xf32>
    %34 = vector.broadcast %33 : vector<8x1xf32> to vector<8x8xf32>
    %35 = arith.addf %32, %34 : vector<8x8xf32>
    %cst_19 = arith.constant 0.000000e+00 : f32
    %36 = vector.broadcast %cst_19 : f32 to vector<8x8xf32>
    %37 = arith.maximumf %35, %36 : vector<8x8xf32>
    %38 = vector.extract_strided_slice %37 {offsets = [0, 0], sizes = [8, 7], strides = [1, 1]} : vector<8x8xf32> to vector<8x7xf32>
    %39 = vector.extract_strided_slice %37 {offsets = [0, 1], sizes = [8, 7], strides = [1, 1]} : vector<8x8xf32> to vector<8x7xf32>
    %40 = arith.maximumf %38, %39 : vector<8x7xf32>
    %41 = arith.truncf %40 : vector<8x7xf32> to vector<8x7xbf16>
    %c0_20 = arith.constant 0 : index
    %c0_21 = arith.constant 0 : index
    %42 = vector.load %arg16[%c0_20, %c0_21] : memref<7x4xbf16, #tpu.memory_space<vmem>>, vector<7x4xbf16>
    %cst_22 = arith.constant dense<0.000000e+00> : vector<8x4xf32>
    %43 = tpu.matmul %41, %42, %cst_22 {dimension_numbers = #tpu.dot_dimension_numbers<[1], [0], [0], [1], [0, 0, 1, 1], [], []>} : vector<8x7xbf16>, vector<7x4xbf16>, vector<8x4xf32> -> vector<8x4xf32>
    %cst_23 = arith.constant 0.000000e+00 : f32
    %44 = vector.broadcast %cst_23 : f32 to vector<8x1xf32>
    %cst_24 = arith.constant 0.000000e+00 : f32
    %45 = vector.broadcast %cst_24 : f32 to vector<8x1xf32>
    %46 = tpu.concatenate %44, %43, %45 in 1 : vector<8x1xf32>, vector<8x4xf32>, vector<8x1xf32> -> vector<8x6xf32>
    %47 = vector.extract_strided_slice %46 {offsets = [0, 0], sizes = [8, 4], strides = [1, 1]} : vector<8x6xf32> to vector<8x4xf32>
    %48 = vector.extract_strided_slice %46 {offsets = [0, 1], sizes = [8, 4], strides = [1, 1]} : vector<8x6xf32> to vector<8x4xf32>
    %49 = vector.extract_strided_slice %46 {offsets = [0, 2], sizes = [8, 4], strides = [1, 1]} : vector<8x6xf32> to vector<8x4xf32>
    %50 = tpu.concatenate %47, %48, %49 in 0 : vector<8x4xf32>, vector<8x4xf32>, vector<8x4xf32> -> vector<24x4xf32>
    %c0_25 = arith.constant 0 : index
    %c0_26 = arith.constant 0 : index
    %51 = vector.load %arg7[%c0_25, %c0_26] : memref<16x24xbf16, #tpu.memory_space<vmem>>, vector<16x24xbf16>
    %52 = arith.truncf %50 : vector<24x4xf32> to vector<24x4xbf16>
    %cst_27 = arith.constant dense<0.000000e+00> : vector<16x4xf32>
    %53 = tpu.matmul %51, %52, %cst_27 {dimension_numbers = #tpu.dot_dimension_numbers<[1], [0], [0], [1], [0, 0, 1, 1], [], []>} : vector<16x24xbf16>, vector<24x4xbf16>, vector<16x4xf32> -> vector<16x4xf32>
    %c0_28 = arith.constant 0 : index
    %c0_29 = arith.constant 0 : index
    %54 = vector.load %arg8[%c0_28, %c0_29] : memref<16x1xf32, #tpu.memory_space<vmem>>, vector<16x1xf32>
    %55 = vector.broadcast %54 : vector<16x1xf32> to vector<16x4xf32>
    %56 = arith.addf %53, %55 : vector<16x4xf32>
    %cst_30 = arith.constant 0.000000e+00 : f32
    %57 = vector.broadcast %cst_30 : f32 to vector<16x4xf32>
    %58 = arith.maximumf %56, %57 : vector<16x4xf32>
    %c0_31 = arith.constant 0 : index
    %c0_32 = arith.constant 0 : index
    %c0_33 = arith.constant 0 : index
    %59 = vector.load %arg2[%c0_31, %c0_32, %c0_33] : memref<1x1x254xf32, #tpu.memory_space<vmem>>, vector<1x1x254xf32>
    %60 = vector.shape_cast %59 : vector<1x1x254xf32> to vector<1x254xf32>
    %61 = vector.extract_strided_slice %60 {offsets = [0, 0], sizes = [1, 216], strides = [1, 1]} : vector<1x254xf32> to vector<1x216xf32>
    %62 = vector.extract_strided_slice %60 {offsets = [0, 1], sizes = [1, 216], strides = [1, 1]} : vector<1x254xf32> to vector<1x216xf32>
    %63 = vector.extract_strided_slice %60 {offsets = [0, 2], sizes = [1, 216], strides = [1, 1]} : vector<1x254xf32> to vector<1x216xf32>
    %64 = vector.extract_strided_slice %60 {offsets = [0, 18], sizes = [1, 216], strides = [1, 1]} : vector<1x254xf32> to vector<1x216xf32>
    %65 = vector.extract_strided_slice %60 {offsets = [0, 19], sizes = [1, 216], strides = [1, 1]} : vector<1x254xf32> to vector<1x216xf32>
    %66 = vector.extract_strided_slice %60 {offsets = [0, 20], sizes = [1, 216], strides = [1, 1]} : vector<1x254xf32> to vector<1x216xf32>
    %67 = vector.extract_strided_slice %60 {offsets = [0, 36], sizes = [1, 216], strides = [1, 1]} : vector<1x254xf32> to vector<1x216xf32>
    %68 = vector.extract_strided_slice %60 {offsets = [0, 37], sizes = [1, 216], strides = [1, 1]} : vector<1x254xf32> to vector<1x216xf32>
    %69 = vector.extract_strided_slice %60 {offsets = [0, 38], sizes = [1, 216], strides = [1, 1]} : vector<1x254xf32> to vector<1x216xf32>
    %70 = tpu.concatenate %61, %62, %63, %64, %65, %66, %67, %68, %69 in 0 : vector<1x216xf32>, vector<1x216xf32>, vector<1x216xf32>, vector<1x216xf32>, vector<1x216xf32>, vector<1x216xf32>, vector<1x216xf32>, vector<1x216xf32>, vector<1x216xf32> -> vector<9x216xf32>
    %c0_34 = arith.constant 0 : index
    %c0_35 = arith.constant 0 : index
    %71 = vector.load %arg9[%c0_34, %c0_35] : memref<4x9xbf16, #tpu.memory_space<vmem>>, vector<4x9xbf16>
    %72 = arith.truncf %70 : vector<9x216xf32> to vector<9x216xbf16>
    %cst_36 = arith.constant dense<0.000000e+00> : vector<4x216xf32>
    %73 = tpu.matmul %71, %72, %cst_36 {dimension_numbers = #tpu.dot_dimension_numbers<[1], [0], [0], [1], [0, 0, 1, 1], [], []>} : vector<4x9xbf16>, vector<9x216xbf16>, vector<4x216xf32> -> vector<4x216xf32>
    %c0_37 = arith.constant 0 : index
    %c0_38 = arith.constant 0 : index
    %74 = vector.load %arg10[%c0_37, %c0_38] : memref<4x1xf32, #tpu.memory_space<vmem>>, vector<4x1xf32>
    %75 = vector.broadcast %74 : vector<4x1xf32> to vector<4x216xf32>
    %76 = arith.addf %73, %75 : vector<4x216xf32>
    %cst_39 = arith.constant 0.000000e+00 : f32
    %77 = vector.broadcast %cst_39 : f32 to vector<4x216xf32>
    %78 = arith.maximumf %76, %77 : vector<4x216xf32>
    %79 = vector.extract_strided_slice %78 {offsets = [0, 0], sizes = [4, 16], strides = [1, 1]} : vector<4x216xf32> to vector<4x16xf32>
    %80 = vector.extract_strided_slice %78 {offsets = [0, 18], sizes = [4, 16], strides = [1, 1]} : vector<4x216xf32> to vector<4x16xf32>
    %81 = arith.addf %79, %80 : vector<4x16xf32>
    %82 = vector.extract_strided_slice %78 {offsets = [0, 36], sizes = [4, 16], strides = [1, 1]} : vector<4x216xf32> to vector<4x16xf32>
    %83 = arith.addf %81, %82 : vector<4x16xf32>
    %84 = vector.extract_strided_slice %78 {offsets = [0, 54], sizes = [4, 16], strides = [1, 1]} : vector<4x216xf32> to vector<4x16xf32>
    %85 = arith.addf %83, %84 : vector<4x16xf32>
    %86 = vector.extract_strided_slice %78 {offsets = [0, 72], sizes = [4, 16], strides = [1, 1]} : vector<4x216xf32> to vector<4x16xf32>
    %87 = arith.addf %85, %86 : vector<4x16xf32>
    %88 = vector.extract_strided_slice %78 {offsets = [0, 90], sizes = [4, 16], strides = [1, 1]} : vector<4x216xf32> to vector<4x16xf32>
    %89 = arith.addf %87, %88 : vector<4x16xf32>
    %90 = vector.extract_strided_slice %78 {offsets = [0, 108], sizes = [4, 16], strides = [1, 1]} : vector<4x216xf32> to vector<4x16xf32>
    %91 = arith.addf %89, %90 : vector<4x16xf32>
    %92 = vector.extract_strided_slice %78 {offsets = [0, 126], sizes = [4, 16], strides = [1, 1]} : vector<4x216xf32> to vector<4x16xf32>
    %93 = arith.addf %91, %92 : vector<4x16xf32>
    %94 = vector.extract_strided_slice %78 {offsets = [0, 144], sizes = [4, 16], strides = [1, 1]} : vector<4x216xf32> to vector<4x16xf32>
    %95 = arith.addf %93, %94 : vector<4x16xf32>
    %96 = vector.extract_strided_slice %78 {offsets = [0, 162], sizes = [4, 16], strides = [1, 1]} : vector<4x216xf32> to vector<4x16xf32>
    %97 = arith.addf %95, %96 : vector<4x16xf32>
    %98 = vector.extract_strided_slice %78 {offsets = [0, 180], sizes = [4, 16], strides = [1, 1]} : vector<4x216xf32> to vector<4x16xf32>
    %99 = arith.addf %97, %98 : vector<4x16xf32>
    %100 = vector.extract_strided_slice %78 {offsets = [0, 198], sizes = [4, 16], strides = [1, 1]} : vector<4x216xf32> to vector<4x16xf32>
    %101 = arith.addf %99, %100 : vector<4x16xf32>
    %cst_40 = arith.constant 0.0833333358 : f32
    %102 = vector.broadcast %cst_40 : f32 to vector<4x16xf32>
    %103 = arith.mulf %101, %102 : vector<4x16xf32>
    %cst_41 = arith.constant 0.000000e+00 : f32
    %104 = vector.broadcast %cst_41 : f32 to vector<4x11xf32>
    %105 = vector.extract_strided_slice %78 {offsets = [0, 0], sizes = [4, 16], strides = [1, 1]} : vector<4x216xf32> to vector<4x16xf32>
    %106 = vector.extract_strided_slice %78 {offsets = [0, 18], sizes = [4, 16], strides = [1, 1]} : vector<4x216xf32> to vector<4x16xf32>
    %107 = arith.maximumf %105, %106 : vector<4x16xf32>
    %108 = vector.extract_strided_slice %107 {offsets = [0, 0], sizes = [4, 15], strides = [1, 1]} : vector<4x16xf32> to vector<4x15xf32>
    %109 = vector.extract_strided_slice %107 {offsets = [0, 1], sizes = [4, 15], strides = [1, 1]} : vector<4x16xf32> to vector<4x15xf32>
    %110 = arith.maximumf %108, %109 : vector<4x15xf32>
    %111 = arith.truncf %110 : vector<4x15xf32> to vector<4x15xbf16>
    %c0_42 = arith.constant 0 : index
    %c0_43 = arith.constant 0 : index
    %112 = vector.load %arg15[%c0_42, %c0_43] : memref<15x8xbf16, #tpu.memory_space<vmem>>, vector<15x8xbf16>
    %cst_44 = arith.constant dense<0.000000e+00> : vector<4x8xf32>
    %113 = tpu.matmul %111, %112, %cst_44 {dimension_numbers = #tpu.dot_dimension_numbers<[1], [0], [0], [1], [0, 0, 1, 1], [], []>} : vector<4x15xbf16>, vector<15x8xbf16>, vector<4x8xf32> -> vector<4x8xf32>
    %114 = vector.extract_strided_slice %78 {offsets = [0, 36], sizes = [4, 16], strides = [1, 1]} : vector<4x216xf32> to vector<4x16xf32>
    %115 = vector.extract_strided_slice %78 {offsets = [0, 54], sizes = [4, 16], strides = [1, 1]} : vector<4x216xf32> to vector<4x16xf32>
    %116 = arith.maximumf %114, %115 : vector<4x16xf32>
    %cst_45 = arith.constant 0.000000e+00 : f32
    %117 = vector.broadcast %cst_45 : f32 to vector<4x2xf32>
    %118 = vector.extract_strided_slice %116 {offsets = [0, 0], sizes = [4, 15], strides = [1, 1]} : vector<4x16xf32> to vector<4x15xf32>
    %119 = vector.extract_strided_slice %116 {offsets = [0, 1], sizes = [4, 15], strides = [1, 1]} : vector<4x16xf32> to vector<4x15xf32>
    %120 = arith.maximumf %118, %119 : vector<4x15xf32>
    %121 = arith.truncf %120 : vector<4x15xf32> to vector<4x15xbf16>
    %c0_46 = arith.constant 0 : index
    %c0_47 = arith.constant 0 : index
    %122 = vector.load %arg15[%c0_46, %c0_47] : memref<15x8xbf16, #tpu.memory_space<vmem>>, vector<15x8xbf16>
    %cst_48 = arith.constant dense<0.000000e+00> : vector<4x8xf32>
    %123 = tpu.matmul %121, %122, %cst_48 {dimension_numbers = #tpu.dot_dimension_numbers<[1], [0], [0], [1], [0, 0, 1, 1], [], []>} : vector<4x15xbf16>, vector<15x8xbf16>, vector<4x8xf32> -> vector<4x8xf32>
    %124 = vector.extract_strided_slice %78 {offsets = [0, 72], sizes = [4, 16], strides = [1, 1]} : vector<4x216xf32> to vector<4x16xf32>
    %125 = vector.extract_strided_slice %78 {offsets = [0, 90], sizes = [4, 16], strides = [1, 1]} : vector<4x216xf32> to vector<4x16xf32>
    %126 = arith.maximumf %124, %125 : vector<4x16xf32>
    %cst_49 = arith.constant 0.000000e+00 : f32
    %127 = vector.broadcast %cst_49 : f32 to vector<4x2xf32>
    %128 = vector.extract_strided_slice %126 {offsets = [0, 0], sizes = [4, 15], strides = [1, 1]} : vector<4x16xf32> to vector<4x15xf32>
    %129 = vector.extract_strided_slice %126 {offsets = [0, 1], sizes = [4, 15], strides = [1, 1]} : vector<4x16xf32> to vector<4x15xf32>
    %130 = arith.maximumf %128, %129 : vector<4x15xf32>
    %131 = arith.truncf %130 : vector<4x15xf32> to vector<4x15xbf16>
    %c0_50 = arith.constant 0 : index
    %c0_51 = arith.constant 0 : index
    %132 = vector.load %arg15[%c0_50, %c0_51] : memref<15x8xbf16, #tpu.memory_space<vmem>>, vector<15x8xbf16>
    %cst_52 = arith.constant dense<0.000000e+00> : vector<4x8xf32>
    %133 = tpu.matmul %131, %132, %cst_52 {dimension_numbers = #tpu.dot_dimension_numbers<[1], [0], [0], [1], [0, 0, 1, 1], [], []>} : vector<4x15xbf16>, vector<15x8xbf16>, vector<4x8xf32> -> vector<4x8xf32>
    %134 = vector.extract_strided_slice %78 {offsets = [0, 108], sizes = [4, 16], strides = [1, 1]} : vector<4x216xf32> to vector<4x16xf32>
    %135 = vector.extract_strided_slice %78 {offsets = [0, 126], sizes = [4, 16], strides = [1, 1]} : vector<4x216xf32> to vector<4x16xf32>
    %136 = arith.maximumf %134, %135 : vector<4x16xf32>
    %cst_53 = arith.constant 0.000000e+00 : f32
    %137 = vector.broadcast %cst_53 : f32 to vector<4x2xf32>
    %138 = vector.extract_strided_slice %136 {offsets = [0, 0], sizes = [4, 15], strides = [1, 1]} : vector<4x16xf32> to vector<4x15xf32>
    %139 = vector.extract_strided_slice %136 {offsets = [0, 1], sizes = [4, 15], strides = [1, 1]} : vector<4x16xf32> to vector<4x15xf32>
    %140 = arith.maximumf %138, %139 : vector<4x15xf32>
    %141 = arith.truncf %140 : vector<4x15xf32> to vector<4x15xbf16>
    %c0_54 = arith.constant 0 : index
    %c0_55 = arith.constant 0 : index
    %142 = vector.load %arg15[%c0_54, %c0_55] : memref<15x8xbf16, #tpu.memory_space<vmem>>, vector<15x8xbf16>
    %cst_56 = arith.constant dense<0.000000e+00> : vector<4x8xf32>
    %143 = tpu.matmul %141, %142, %cst_56 {dimension_numbers = #tpu.dot_dimension_numbers<[1], [0], [0], [1], [0, 0, 1, 1], [], []>} : vector<4x15xbf16>, vector<15x8xbf16>, vector<4x8xf32> -> vector<4x8xf32>
    %144 = vector.extract_strided_slice %78 {offsets = [0, 144], sizes = [4, 16], strides = [1, 1]} : vector<4x216xf32> to vector<4x16xf32>
    %145 = vector.extract_strided_slice %78 {offsets = [0, 162], sizes = [4, 16], strides = [1, 1]} : vector<4x216xf32> to vector<4x16xf32>
    %146 = arith.maximumf %144, %145 : vector<4x16xf32>
    %cst_57 = arith.constant 0.000000e+00 : f32
    %147 = vector.broadcast %cst_57 : f32 to vector<4x2xf32>
    %148 = vector.extract_strided_slice %146 {offsets = [0, 0], sizes = [4, 15], strides = [1, 1]} : vector<4x16xf32> to vector<4x15xf32>
    %149 = vector.extract_strided_slice %146 {offsets = [0, 1], sizes = [4, 15], strides = [1, 1]} : vector<4x16xf32> to vector<4x15xf32>
    %150 = arith.maximumf %148, %149 : vector<4x15xf32>
    %151 = arith.truncf %150 : vector<4x15xf32> to vector<4x15xbf16>
    %c0_58 = arith.constant 0 : index
    %c0_59 = arith.constant 0 : index
    %152 = vector.load %arg15[%c0_58, %c0_59] : memref<15x8xbf16, #tpu.memory_space<vmem>>, vector<15x8xbf16>
    %cst_60 = arith.constant dense<0.000000e+00> : vector<4x8xf32>
    %153 = tpu.matmul %151, %152, %cst_60 {dimension_numbers = #tpu.dot_dimension_numbers<[1], [0], [0], [1], [0, 0, 1, 1], [], []>} : vector<4x15xbf16>, vector<15x8xbf16>, vector<4x8xf32> -> vector<4x8xf32>
    %154 = vector.extract_strided_slice %78 {offsets = [0, 180], sizes = [4, 16], strides = [1, 1]} : vector<4x216xf32> to vector<4x16xf32>
    %155 = vector.extract_strided_slice %78 {offsets = [0, 198], sizes = [4, 16], strides = [1, 1]} : vector<4x216xf32> to vector<4x16xf32>
    %156 = arith.maximumf %154, %155 : vector<4x16xf32>
    %cst_61 = arith.constant 0.000000e+00 : f32
    %157 = vector.broadcast %cst_61 : f32 to vector<4x2xf32>
    %158 = vector.extract_strided_slice %156 {offsets = [0, 0], sizes = [4, 15], strides = [1, 1]} : vector<4x16xf32> to vector<4x15xf32>
    %159 = vector.extract_strided_slice %156 {offsets = [0, 1], sizes = [4, 15], strides = [1, 1]} : vector<4x16xf32> to vector<4x15xf32>
    %160 = arith.maximumf %158, %159 : vector<4x15xf32>
    %161 = arith.truncf %160 : vector<4x15xf32> to vector<4x15xbf16>
    %c0_62 = arith.constant 0 : index
    %c0_63 = arith.constant 0 : index
    %162 = vector.load %arg15[%c0_62, %c0_63] : memref<15x8xbf16, #tpu.memory_space<vmem>>, vector<15x8xbf16>
    %cst_64 = arith.constant dense<0.000000e+00> : vector<4x8xf32>
    %163 = tpu.matmul %161, %162, %cst_64 {dimension_numbers = #tpu.dot_dimension_numbers<[1], [0], [0], [1], [0, 0, 1, 1], [], []>} : vector<4x15xbf16>, vector<15x8xbf16>, vector<4x8xf32> -> vector<4x8xf32>
    %cst_65 = arith.constant 0.000000e+00 : f32
    %164 = vector.broadcast %cst_65 : f32 to vector<4x13xf32>
    %165 = tpu.concatenate %104, %113, %117, %123, %127, %133, %137, %143, %147, %153, %157, %163, %164 in 1 : vector<4x11xf32>, vector<4x8xf32>, vector<4x2xf32>, vector<4x8xf32>, vector<4x2xf32>, vector<4x8xf32>, vector<4x2xf32>, vector<4x8xf32>, vector<4x2xf32>, vector<4x8xf32>, vector<4x2xf32>, vector<4x8xf32>, vector<4x13xf32> -> vector<4x82xf32>
    %166 = vector.extract_strided_slice %165 {offsets = [0, 0], sizes = [4, 60], strides = [1, 1]} : vector<4x82xf32> to vector<4x60xf32>
    %167 = vector.extract_strided_slice %165 {offsets = [0, 1], sizes = [4, 60], strides = [1, 1]} : vector<4x82xf32> to vector<4x60xf32>
    %168 = vector.extract_strided_slice %165 {offsets = [0, 2], sizes = [4, 60], strides = [1, 1]} : vector<4x82xf32> to vector<4x60xf32>
    %169 = vector.extract_strided_slice %165 {offsets = [0, 10], sizes = [4, 60], strides = [1, 1]} : vector<4x82xf32> to vector<4x60xf32>
    %170 = vector.extract_strided_slice %165 {offsets = [0, 11], sizes = [4, 60], strides = [1, 1]} : vector<4x82xf32> to vector<4x60xf32>
    %171 = vector.extract_strided_slice %165 {offsets = [0, 12], sizes = [4, 60], strides = [1, 1]} : vector<4x82xf32> to vector<4x60xf32>
    %172 = vector.extract_strided_slice %165 {offsets = [0, 20], sizes = [4, 60], strides = [1, 1]} : vector<4x82xf32> to vector<4x60xf32>
    %173 = vector.extract_strided_slice %165 {offsets = [0, 21], sizes = [4, 60], strides = [1, 1]} : vector<4x82xf32> to vector<4x60xf32>
    %174 = vector.extract_strided_slice %165 {offsets = [0, 22], sizes = [4, 60], strides = [1, 1]} : vector<4x82xf32> to vector<4x60xf32>
    %175 = tpu.concatenate %166, %167, %168, %169, %170, %171, %172, %173, %174 in 0 : vector<4x60xf32>, vector<4x60xf32>, vector<4x60xf32>, vector<4x60xf32>, vector<4x60xf32>, vector<4x60xf32>, vector<4x60xf32>, vector<4x60xf32>, vector<4x60xf32> -> vector<36x60xf32>
    %c0_66 = arith.constant 0 : index
    %c0_67 = arith.constant 0 : index
    %176 = vector.load %arg11[%c0_66, %c0_67] : memref<8x36xbf16, #tpu.memory_space<vmem>>, vector<8x36xbf16>
    %177 = arith.truncf %175 : vector<36x60xf32> to vector<36x60xbf16>
    %cst_68 = arith.constant dense<0.000000e+00> : vector<8x60xf32>
    %178 = tpu.matmul %176, %177, %cst_68 {dimension_numbers = #tpu.dot_dimension_numbers<[1], [0], [0], [1], [0, 0, 1, 1], [], []>} : vector<8x36xbf16>, vector<36x60xbf16>, vector<8x60xf32> -> vector<8x60xf32>
    %c0_69 = arith.constant 0 : index
    %c0_70 = arith.constant 0 : index
    %179 = vector.load %arg12[%c0_69, %c0_70] : memref<8x1xf32, #tpu.memory_space<vmem>>, vector<8x1xf32>
    %180 = vector.broadcast %179 : vector<8x1xf32> to vector<8x60xf32>
    %181 = arith.addf %178, %180 : vector<8x60xf32>
    %cst_71 = arith.constant 0.000000e+00 : f32
    %182 = vector.broadcast %cst_71 : f32 to vector<8x60xf32>
    %183 = arith.maximumf %181, %182 : vector<8x60xf32>
    %184 = vector.extract_strided_slice %183 {offsets = [0, 0], sizes = [8, 8], strides = [1, 1]} : vector<8x60xf32> to vector<8x8xf32>
    %185 = vector.extract_strided_slice %183 {offsets = [0, 10], sizes = [8, 8], strides = [1, 1]} : vector<8x60xf32> to vector<8x8xf32>
    %186 = arith.addf %184, %185 : vector<8x8xf32>
    %187 = vector.extract_strided_slice %183 {offsets = [0, 20], sizes = [8, 8], strides = [1, 1]} : vector<8x60xf32> to vector<8x8xf32>
    %188 = arith.addf %186, %187 : vector<8x8xf32>
    %189 = vector.extract_strided_slice %183 {offsets = [0, 30], sizes = [8, 8], strides = [1, 1]} : vector<8x60xf32> to vector<8x8xf32>
    %190 = arith.addf %188, %189 : vector<8x8xf32>
    %191 = vector.extract_strided_slice %183 {offsets = [0, 40], sizes = [8, 8], strides = [1, 1]} : vector<8x60xf32> to vector<8x8xf32>
    %192 = arith.addf %190, %191 : vector<8x8xf32>
    %193 = vector.extract_strided_slice %183 {offsets = [0, 50], sizes = [8, 8], strides = [1, 1]} : vector<8x60xf32> to vector<8x8xf32>
    %194 = arith.addf %192, %193 : vector<8x8xf32>
    %cst_72 = arith.constant 0.166666672 : f32
    %195 = vector.broadcast %cst_72 : f32 to vector<8x8xf32>
    %196 = arith.mulf %194, %195 : vector<8x8xf32>
    %cst_73 = arith.constant 0.000000e+00 : f32
    %197 = vector.broadcast %cst_73 : f32 to vector<8x7xf32>
    %198 = vector.extract_strided_slice %183 {offsets = [0, 0], sizes = [8, 8], strides = [1, 1]} : vector<8x60xf32> to vector<8x8xf32>
    %199 = vector.extract_strided_slice %183 {offsets = [0, 10], sizes = [8, 8], strides = [1, 1]} : vector<8x60xf32> to vector<8x8xf32>
    %200 = arith.maximumf %198, %199 : vector<8x8xf32>
    %201 = vector.extract_strided_slice %200 {offsets = [0, 0], sizes = [8, 7], strides = [1, 1]} : vector<8x8xf32> to vector<8x7xf32>
    %202 = vector.extract_strided_slice %200 {offsets = [0, 1], sizes = [8, 7], strides = [1, 1]} : vector<8x8xf32> to vector<8x7xf32>
    %203 = arith.maximumf %201, %202 : vector<8x7xf32>
    %204 = arith.truncf %203 : vector<8x7xf32> to vector<8x7xbf16>
    %c0_74 = arith.constant 0 : index
    %c0_75 = arith.constant 0 : index
    %205 = vector.load %arg16[%c0_74, %c0_75] : memref<7x4xbf16, #tpu.memory_space<vmem>>, vector<7x4xbf16>
    %cst_76 = arith.constant dense<0.000000e+00> : vector<8x4xf32>
    %206 = tpu.matmul %204, %205, %cst_76 {dimension_numbers = #tpu.dot_dimension_numbers<[1], [0], [0], [1], [0, 0, 1, 1], [], []>} : vector<8x7xbf16>, vector<7x4xbf16>, vector<8x4xf32> -> vector<8x4xf32>
    %207 = vector.extract_strided_slice %183 {offsets = [0, 20], sizes = [8, 8], strides = [1, 1]} : vector<8x60xf32> to vector<8x8xf32>
    %208 = vector.extract_strided_slice %183 {offsets = [0, 30], sizes = [8, 8], strides = [1, 1]} : vector<8x60xf32> to vector<8x8xf32>
    %209 = arith.maximumf %207, %208 : vector<8x8xf32>
    %cst_77 = arith.constant 0.000000e+00 : f32
    %210 = vector.broadcast %cst_77 : f32 to vector<8x2xf32>
    %211 = vector.extract_strided_slice %209 {offsets = [0, 0], sizes = [8, 7], strides = [1, 1]} : vector<8x8xf32> to vector<8x7xf32>
    %212 = vector.extract_strided_slice %209 {offsets = [0, 1], sizes = [8, 7], strides = [1, 1]} : vector<8x8xf32> to vector<8x7xf32>
    %213 = arith.maximumf %211, %212 : vector<8x7xf32>
    %214 = arith.truncf %213 : vector<8x7xf32> to vector<8x7xbf16>
    %c0_78 = arith.constant 0 : index
    %c0_79 = arith.constant 0 : index
    %215 = vector.load %arg16[%c0_78, %c0_79] : memref<7x4xbf16, #tpu.memory_space<vmem>>, vector<7x4xbf16>
    %cst_80 = arith.constant dense<0.000000e+00> : vector<8x4xf32>
    %216 = tpu.matmul %214, %215, %cst_80 {dimension_numbers = #tpu.dot_dimension_numbers<[1], [0], [0], [1], [0, 0, 1, 1], [], []>} : vector<8x7xbf16>, vector<7x4xbf16>, vector<8x4xf32> -> vector<8x4xf32>
    %217 = vector.extract_strided_slice %183 {offsets = [0, 40], sizes = [8, 8], strides = [1, 1]} : vector<8x60xf32> to vector<8x8xf32>
    %218 = vector.extract_strided_slice %183 {offsets = [0, 50], sizes = [8, 8], strides = [1, 1]} : vector<8x60xf32> to vector<8x8xf32>
    %219 = arith.maximumf %217, %218 : vector<8x8xf32>
    %cst_81 = arith.constant 0.000000e+00 : f32
    %220 = vector.broadcast %cst_81 : f32 to vector<8x2xf32>
    %221 = vector.extract_strided_slice %219 {offsets = [0, 0], sizes = [8, 7], strides = [1, 1]} : vector<8x8xf32> to vector<8x7xf32>
    %222 = vector.extract_strided_slice %219 {offsets = [0, 1], sizes = [8, 7], strides = [1, 1]} : vector<8x8xf32> to vector<8x7xf32>
    %223 = arith.maximumf %221, %222 : vector<8x7xf32>
    %224 = arith.truncf %223 : vector<8x7xf32> to vector<8x7xbf16>
    %c0_82 = arith.constant 0 : index
    %c0_83 = arith.constant 0 : index
    %225 = vector.load %arg16[%c0_82, %c0_83] : memref<7x4xbf16, #tpu.memory_space<vmem>>, vector<7x4xbf16>
    %cst_84 = arith.constant dense<0.000000e+00> : vector<8x4xf32>
    %226 = tpu.matmul %224, %225, %cst_84 {dimension_numbers = #tpu.dot_dimension_numbers<[1], [0], [0], [1], [0, 0, 1, 1], [], []>} : vector<8x7xbf16>, vector<7x4xbf16>, vector<8x4xf32> -> vector<8x4xf32>
    %cst_85 = arith.constant 0.000000e+00 : f32
    %227 = vector.broadcast %cst_85 : f32 to vector<8x9xf32>
    %228 = tpu.concatenate %197, %206, %210, %216, %220, %226, %227 in 1 : vector<8x7xf32>, vector<8x4xf32>, vector<8x2xf32>, vector<8x4xf32>, vector<8x2xf32>, vector<8x4xf32>, vector<8x9xf32> -> vector<8x32xf32>
    %229 = vector.extract_strided_slice %228 {offsets = [0, 0], sizes = [8, 18], strides = [1, 1]} : vector<8x32xf32> to vector<8x18xf32>
    %230 = vector.extract_strided_slice %228 {offsets = [0, 1], sizes = [8, 18], strides = [1, 1]} : vector<8x32xf32> to vector<8x18xf32>
    %231 = vector.extract_strided_slice %228 {offsets = [0, 2], sizes = [8, 18], strides = [1, 1]} : vector<8x32xf32> to vector<8x18xf32>
    %232 = vector.extract_strided_slice %228 {offsets = [0, 6], sizes = [8, 18], strides = [1, 1]} : vector<8x32xf32> to vector<8x18xf32>
    %233 = vector.extract_strided_slice %228 {offsets = [0, 7], sizes = [8, 18], strides = [1, 1]} : vector<8x32xf32> to vector<8x18xf32>
    %234 = vector.extract_strided_slice %228 {offsets = [0, 8], sizes = [8, 18], strides = [1, 1]} : vector<8x32xf32> to vector<8x18xf32>
    %235 = vector.extract_strided_slice %228 {offsets = [0, 12], sizes = [8, 18], strides = [1, 1]} : vector<8x32xf32> to vector<8x18xf32>
    %236 = vector.extract_strided_slice %228 {offsets = [0, 13], sizes = [8, 18], strides = [1, 1]} : vector<8x32xf32> to vector<8x18xf32>
    %237 = vector.extract_strided_slice %228 {offsets = [0, 14], sizes = [8, 18], strides = [1, 1]} : vector<8x32xf32> to vector<8x18xf32>
    %238 = tpu.concatenate %229, %230, %231, %232, %233, %234, %235, %236, %237 in 0 : vector<8x18xf32>, vector<8x18xf32>, vector<8x18xf32>, vector<8x18xf32>, vector<8x18xf32>, vector<8x18xf32>, vector<8x18xf32>, vector<8x18xf32>, vector<8x18xf32> -> vector<72x18xf32>
    %c0_86 = arith.constant 0 : index
    %c0_87 = arith.constant 0 : index
    %239 = vector.load %arg13[%c0_86, %c0_87] : memref<16x72xbf16, #tpu.memory_space<vmem>>, vector<16x72xbf16>
    %240 = arith.truncf %238 : vector<72x18xf32> to vector<72x18xbf16>
    %cst_88 = arith.constant dense<0.000000e+00> : vector<16x18xf32>
    %241 = tpu.matmul %239, %240, %cst_88 {dimension_numbers = #tpu.dot_dimension_numbers<[1], [0], [0], [1], [0, 0, 1, 1], [], []>} : vector<16x72xbf16>, vector<72x18xbf16>, vector<16x18xf32> -> vector<16x18xf32>
    %c0_89 = arith.constant 0 : index
    %c0_90 = arith.constant 0 : index
    %242 = vector.load %arg14[%c0_89, %c0_90] : memref<16x1xf32, #tpu.memory_space<vmem>>, vector<16x1xf32>
    %243 = vector.broadcast %242 : vector<16x1xf32> to vector<16x18xf32>
    %244 = arith.addf %241, %243 : vector<16x18xf32>
    %cst_91 = arith.constant 0.000000e+00 : f32
    %245 = vector.broadcast %cst_91 : f32 to vector<16x18xf32>
    %246 = arith.maximumf %244, %245 : vector<16x18xf32>
    %247 = vector.extract_strided_slice %246 {offsets = [0, 0], sizes = [16, 4], strides = [1, 1]} : vector<16x18xf32> to vector<16x4xf32>
    %248 = vector.extract_strided_slice %246 {offsets = [0, 6], sizes = [16, 4], strides = [1, 1]} : vector<16x18xf32> to vector<16x4xf32>
    %249 = arith.addf %247, %248 : vector<16x4xf32>
    %250 = vector.extract_strided_slice %246 {offsets = [0, 12], sizes = [16, 4], strides = [1, 1]} : vector<16x18xf32> to vector<16x4xf32>
    %251 = arith.addf %249, %250 : vector<16x4xf32>
    %cst_92 = arith.constant 0.333333343 : f32
    %252 = vector.broadcast %cst_92 : f32 to vector<16x4xf32>
    %253 = arith.mulf %251, %252 : vector<16x4xf32>
    %254 = tpu.concatenate %253, %58 in 0 : vector<16x4xf32>, vector<16x4xf32> -> vector<32x4xf32>
    %cst_93 = arith.constant 0.000000e+00 : f32
    %255 = vector.broadcast %cst_93 : f32 to vector<32x1xf32>
    %cst_94 = arith.constant 0.000000e+00 : f32
    %256 = vector.broadcast %cst_94 : f32 to vector<32x1xf32>
    %257 = tpu.concatenate %255, %254, %256 in 1 : vector<32x1xf32>, vector<32x4xf32>, vector<32x1xf32> -> vector<32x6xf32>
    %258 = vector.extract_strided_slice %257 {offsets = [0, 0], sizes = [32, 4], strides = [1, 1]} : vector<32x6xf32> to vector<32x4xf32>
    %259 = vector.extract_strided_slice %257 {offsets = [0, 1], sizes = [32, 4], strides = [1, 1]} : vector<32x6xf32> to vector<32x4xf32>
    %260 = vector.extract_strided_slice %257 {offsets = [0, 2], sizes = [32, 4], strides = [1, 1]} : vector<32x6xf32> to vector<32x4xf32>
    %261 = tpu.concatenate %258, %259, %260 in 0 : vector<32x4xf32>, vector<32x4xf32>, vector<32x4xf32> -> vector<96x4xf32>
    %c0_95 = arith.constant 0 : index
    %c0_96 = arith.constant 0 : index
    %262 = vector.load %arg17[%c0_95, %c0_96] : memref<16x96xbf16, #tpu.memory_space<vmem>>, vector<16x96xbf16>
    %263 = arith.truncf %261 : vector<96x4xf32> to vector<96x4xbf16>
    %cst_97 = arith.constant dense<0.000000e+00> : vector<16x4xf32>
    %264 = tpu.matmul %262, %263, %cst_97 {dimension_numbers = #tpu.dot_dimension_numbers<[1], [0], [0], [1], [0, 0, 1, 1], [], []>} : vector<16x96xbf16>, vector<96x4xbf16>, vector<16x4xf32> -> vector<16x4xf32>
    %c0_98 = arith.constant 0 : index
    %c0_99 = arith.constant 0 : index
    %265 = vector.load %arg18[%c0_98, %c0_99] : memref<16x1xf32, #tpu.memory_space<vmem>>, vector<16x1xf32>
    %266 = vector.broadcast %265 : vector<16x1xf32> to vector<16x4xf32>
    %267 = arith.addf %264, %266 : vector<16x4xf32>
    %268 = arith.truncf %267 : vector<16x4xf32> to vector<16x4xbf16>
    %c0_100 = arith.constant 0 : index
    %c0_101 = arith.constant 0 : index
    %269 = vector.load %arg19[%c0_100, %c0_101] : memref<4x8xbf16, #tpu.memory_space<vmem>>, vector<4x8xbf16>
    %cst_102 = arith.constant dense<0.000000e+00> : vector<16x8xf32>
    %270 = tpu.matmul %268, %269, %cst_102 {dimension_numbers = #tpu.dot_dimension_numbers<[1], [0], [0], [1], [0, 0, 1, 1], [], []>} : vector<16x4xbf16>, vector<4x8xbf16>, vector<16x8xf32> -> vector<16x8xf32>
    %271 = tpu.concatenate %270, %196, %37 in 0 : vector<16x8xf32>, vector<8x8xf32>, vector<8x8xf32> -> vector<32x8xf32>
    %cst_103 = arith.constant 0.000000e+00 : f32
    %272 = vector.broadcast %cst_103 : f32 to vector<32x1xf32>
    %cst_104 = arith.constant 0.000000e+00 : f32
    %273 = vector.broadcast %cst_104 : f32 to vector<32x1xf32>
    %274 = tpu.concatenate %272, %271, %273 in 1 : vector<32x1xf32>, vector<32x8xf32>, vector<32x1xf32> -> vector<32x10xf32>
    %275 = vector.extract_strided_slice %274 {offsets = [0, 0], sizes = [32, 8], strides = [1, 1]} : vector<32x10xf32> to vector<32x8xf32>
    %276 = vector.extract_strided_slice %274 {offsets = [0, 1], sizes = [32, 8], strides = [1, 1]} : vector<32x10xf32> to vector<32x8xf32>
    %277 = vector.extract_strided_slice %274 {offsets = [0, 2], sizes = [32, 8], strides = [1, 1]} : vector<32x10xf32> to vector<32x8xf32>
    %278 = tpu.concatenate %275, %276, %277 in 0 : vector<32x8xf32>, vector<32x8xf32>, vector<32x8xf32> -> vector<96x8xf32>
    %c0_105 = arith.constant 0 : index
    %c0_106 = arith.constant 0 : index
    %279 = vector.load %arg20[%c0_105, %c0_106] : memref<8x96xbf16, #tpu.memory_space<vmem>>, vector<8x96xbf16>
    %280 = arith.truncf %278 : vector<96x8xf32> to vector<96x8xbf16>
    %cst_107 = arith.constant dense<0.000000e+00> : vector<8x8xf32>
    %281 = tpu.matmul %279, %280, %cst_107 {dimension_numbers = #tpu.dot_dimension_numbers<[1], [0], [0], [1], [0, 0, 1, 1], [], []>} : vector<8x96xbf16>, vector<96x8xbf16>, vector<8x8xf32> -> vector<8x8xf32>
    %c0_108 = arith.constant 0 : index
    %c0_109 = arith.constant 0 : index
    %282 = vector.load %arg21[%c0_108, %c0_109] : memref<8x1xf32, #tpu.memory_space<vmem>>, vector<8x1xf32>
    %283 = vector.broadcast %282 : vector<8x1xf32> to vector<8x8xf32>
    %284 = arith.addf %281, %283 : vector<8x8xf32>
    %cst_110 = arith.constant 0.000000e+00 : f32
    %285 = vector.broadcast %cst_110 : f32 to vector<8x8xf32>
    %286 = arith.maximumf %284, %285 : vector<8x8xf32>
    %287 = arith.truncf %286 : vector<8x8xf32> to vector<8x8xbf16>
    %c0_111 = arith.constant 0 : index
    %c0_112 = arith.constant 0 : index
    %288 = vector.load %arg22[%c0_111, %c0_112] : memref<8x16xbf16, #tpu.memory_space<vmem>>, vector<8x16xbf16>
    %cst_113 = arith.constant dense<0.000000e+00> : vector<8x16xf32>
    %289 = tpu.matmul %287, %288, %cst_113 {dimension_numbers = #tpu.dot_dimension_numbers<[1], [0], [0], [1], [0, 0, 1, 1], [], []>} : vector<8x8xbf16>, vector<8x16xbf16>, vector<8x16xf32> -> vector<8x16xf32>
    %290 = tpu.concatenate %289, %103, %16 in 0 : vector<8x16xf32>, vector<4x16xf32>, vector<4x16xf32> -> vector<16x16xf32>
    %cst_114 = arith.constant 0.000000e+00 : f32
    %291 = vector.broadcast %cst_114 : f32 to vector<16x1xf32>
    %cst_115 = arith.constant 0.000000e+00 : f32
    %292 = vector.broadcast %cst_115 : f32 to vector<16x1xf32>
    %293 = tpu.concatenate %291, %290, %292 in 1 : vector<16x1xf32>, vector<16x16xf32>, vector<16x1xf32> -> vector<16x18xf32>
    %294 = vector.extract_strided_slice %293 {offsets = [0, 0], sizes = [16, 16], strides = [1, 1]} : vector<16x18xf32> to vector<16x16xf32>
    %295 = vector.extract_strided_slice %293 {offsets = [0, 1], sizes = [16, 16], strides = [1, 1]} : vector<16x18xf32> to vector<16x16xf32>
    %296 = vector.extract_strided_slice %293 {offsets = [0, 2], sizes = [16, 16], strides = [1, 1]} : vector<16x18xf32> to vector<16x16xf32>
    %297 = tpu.concatenate %294, %295, %296 in 0 : vector<16x16xf32>, vector<16x16xf32>, vector<16x16xf32> -> vector<48x16xf32>
    %c0_116 = arith.constant 0 : index
    %c0_117 = arith.constant 0 : index
    %298 = vector.load %arg23[%c0_116, %c0_117] : memref<4x48xbf16, #tpu.memory_space<vmem>>, vector<4x48xbf16>
    %299 = arith.truncf %297 : vector<48x16xf32> to vector<48x16xbf16>
    %cst_118 = arith.constant dense<0.000000e+00> : vector<4x16xf32>
    %300 = tpu.matmul %298, %299, %cst_118 {dimension_numbers = #tpu.dot_dimension_numbers<[1], [0], [0], [1], [0, 0, 1, 1], [], []>} : vector<4x48xbf16>, vector<48x16xbf16>, vector<4x16xf32> -> vector<4x16xf32>
    %c0_119 = arith.constant 0 : index
    %c0_120 = arith.constant 0 : index
    %301 = vector.load %arg24[%c0_119, %c0_120] : memref<4x1xf32, #tpu.memory_space<vmem>>, vector<4x1xf32>
    %302 = vector.broadcast %301 : vector<4x1xf32> to vector<4x16xf32>
    %303 = arith.addf %300, %302 : vector<4x16xf32>
    %cst_121 = arith.constant 0.000000e+00 : f32
    %304 = vector.broadcast %cst_121 : f32 to vector<4x16xf32>
    %305 = arith.maximumf %303, %304 : vector<4x16xf32>
    %c0_122 = arith.constant 0 : index
    %c0_123 = arith.constant 0 : index
    %306 = vector.load %arg25[%c0_122, %c0_123] : memref<3x4xbf16, #tpu.memory_space<vmem>>, vector<3x4xbf16>
    %307 = arith.truncf %305 : vector<4x16xf32> to vector<4x16xbf16>
    %cst_124 = arith.constant dense<0.000000e+00> : vector<3x16xf32>
    %308 = tpu.matmul %306, %307, %cst_124 {dimension_numbers = #tpu.dot_dimension_numbers<[1], [0], [0], [1], [0, 0, 1, 1], [], []>} : vector<3x4xbf16>, vector<4x16xbf16>, vector<3x16xf32> -> vector<3x16xf32>
    %c0_125 = arith.constant 0 : index
    %c0_126 = arith.constant 0 : index
    %309 = vector.load %arg26[%c0_125, %c0_126] : memref<3x1xf32, #tpu.memory_space<vmem>>, vector<3x1xf32>
    %310 = vector.broadcast %309 : vector<3x1xf32> to vector<3x16xf32>
    %311 = arith.addf %308, %310 : vector<3x16xf32>
    %cst_127 = arith.constant dense<0xFF800000> : vector<16xf32>
    %312 = vector.multi_reduction <maximumf>, %311, %cst_127 [0] : vector<3x16xf32> to vector<16xf32>
    %313 = vector.shape_cast %312 : vector<16xf32> to vector<1x16xf32>
    %314 = vector.broadcast %313 : vector<1x16xf32> to vector<3x16xf32>
    %315 = arith.subf %311, %314 : vector<3x16xf32>
    %316 = math.exp %315 : vector<3x16xf32>
    %cst_128 = arith.constant dense<0.000000e+00> : vector<16xf32>
    %317 = vector.multi_reduction <add>, %316, %cst_128 [0] : vector<3x16xf32> to vector<16xf32>
    %318 = vector.shape_cast %317 : vector<16xf32> to vector<1x16xf32>
    %319 = tpu.reciprocal %318 {approx = true} : vector<1x16xf32> -> vector<1x16xf32>
    %320 = vector.broadcast %319 : vector<1x16xf32> to vector<3x16xf32>
    %321 = arith.mulf %316, %320 : vector<3x16xf32>
    %c0_129 = arith.constant 0 : index
    %c0_130 = arith.constant 0 : index
    %c0_131 = arith.constant 0 : index
    %322 = vector.load %arg27[%c0_129, %c0_130, %c0_131] : memref<1x3x16xf32, #tpu.memory_space<vmem>>, vector<1x3x16xf32>
    %323 = vector.shape_cast %322 : vector<1x3x16xf32> to vector<3x16xf32>
    %324 = vector.shape_cast %321 : vector<3x16xf32> to vector<1x3x16xf32>
    tpu.vector_store %arg27[%c0_129, %c0_130, %c0_131], %324 {strides = array<i32>} : memref<1x3x16xf32, #tpu.memory_space<vmem>>, vector<1x3x16xf32>,
    return
  }
  func.func @transform_0(%arg0: i32) -> (i32, i32, i32) {
    %c0_i32 = arith.constant 0 : i32
    %c0_i32_0 = arith.constant 0 : i32
    %c0_i32_1 = arith.constant 0 : i32
    return %arg0, %c0_i32, %c0_i32_0 : i32, i32, i32
  }
  func.func @transform_1(%arg0: i32) -> (i32, i32, i32) {
    %c0_i32 = arith.constant 0 : i32
    %c0_i32_0 = arith.constant 0 : i32
    %c0_i32_1 = arith.constant 0 : i32
    return %arg0, %c0_i32, %c0_i32_0 : i32, i32, i32
  }
  func.func @transform_2(%arg0: i32) -> (i32, i32) {
    %c0_i32 = arith.constant 0 : i32
    %c0_i32_0 = arith.constant 0 : i32
    %c0_i32_1 = arith.constant 0 : i32
    return %c0_i32, %c0_i32_0 : i32, i32
  }
  func.func @transform_3(%arg0: i32) -> (i32, i32) {
    %c0_i32 = arith.constant 0 : i32
    %c0_i32_0 = arith.constant 0 : i32
    %c0_i32_1 = arith.constant 0 : i32
    return %c0_i32, %c0_i32_0 : i32, i32
  }
  func.func @transform_4(%arg0: i32) -> (i32, i32) {
    %c0_i32 = arith.constant 0 : i32
    %c0_i32_0 = arith.constant 0 : i32
    %c0_i32_1 = arith.constant 0 : i32
    return %c0_i32, %c0_i32_0 : i32, i32
  }
  func.func @transform_5(%arg0: i32) -> (i32, i32) {
    %c0_i32 = arith.constant 0 : i32
    %c0_i32_0 = arith.constant 0 : i32
    %c0_i32_1 = arith.constant 0 : i32
    return %c0_i32, %c0_i32_0 : i32, i32
  }
  func.func @transform_6(%arg0: i32) -> (i32, i32) {
    %c0_i32 = arith.constant 0 : i32
    %c0_i32_0 = arith.constant 0 : i32
    %c0_i32_1 = arith.constant 0 : i32
    return %c0_i32, %c0_i32_0 : i32, i32
  }
  func.func @transform_7(%arg0: i32) -> (i32, i32) {
    %c0_i32 = arith.constant 0 : i32
    %c0_i32_0 = arith.constant 0 : i32
    %c0_i32_1 = arith.constant 0 : i32
    return %c0_i32, %c0_i32_0 : i32, i32
  }
  func.func @transform_8(%arg0: i32) -> (i32, i32) {
    %c0_i32 = arith.constant 0 : i32
    %c0_i32_0 = arith.constant 0 : i32
    %c0_i32_1 = arith.constant 0 : i32
    return %c0_i32, %c0_i32_0 : i32, i32
  }
  func.func @transform_9(%arg0: i32) -> (i32, i32) {
    %c0_i32 = arith.constant 0 : i32
    %c0_i32_0 = arith.constant 0 : i32
    %c0_i32_1 = arith.constant 0 : i32
    return %c0_i32, %c0_i32_0 : i32, i32
  }
  func.func @transform_10(%arg0: i32) -> (i32, i32) {
    %c0_i32 = arith.constant 0 : i32
    %c0_i32_0 = arith.constant 0 : i32
    %c0_i32_1 = arith.constant 0 : i32
    return %c0_i32, %c0_i32_0 : i32, i32
  }
  func.func @transform_11(%arg0: i32) -> (i32, i32) {
    %c0_i32 = arith.constant 0 : i32
    %c0_i32_0 = arith.constant 0 : i32
    %c0_i32_1 = arith.constant 0 : i32
    return %c0_i32, %c0_i32_0 : i32, i32
  }
  func.func @transform_12(%arg0: i32) -> (i32, i32) {
    %c0_i32 = arith.constant 0 : i32
    %c0_i32_0 = arith.constant 0 : i32
    %c0_i32_1 = arith.constant 0 : i32
    return %c0_i32, %c0_i32_0 : i32, i32
  }
  func.func @transform_13(%arg0: i32) -> (i32, i32) {
    %c0_i32 = arith.constant 0 : i32
    %c0_i32_0 = arith.constant 0 : i32
    %c0_i32_1 = arith.constant 0 : i32
    return %c0_i32, %c0_i32_0 : i32, i32
  }
  func.func @transform_14(%arg0: i32) -> (i32, i32) {
    %c0_i32 = arith.constant 0 : i32
    %c0_i32_0 = arith.constant 0 : i32
    %c0_i32_1 = arith.constant 0 : i32
    return %c0_i32, %c0_i32_0 : i32, i32
  }
  func.func @transform_15(%arg0: i32) -> (i32, i32) {
    %c0_i32 = arith.constant 0 : i32
    %c0_i32_0 = arith.constant 0 : i32
    %c0_i32_1 = arith.constant 0 : i32
    return %c0_i32, %c0_i32_0 : i32, i32
  }
  func.func @transform_16(%arg0: i32) -> (i32, i32) {
    %c0_i32 = arith.constant 0 : i32
    %c0_i32_0 = arith.constant 0 : i32
    %c0_i32_1 = arith.constant 0 : i32
    return %c0_i32, %c0_i32_0 : i32, i32
  }
  func.func @transform_17(%arg0: i32) -> (i32, i32) {
    %c0_i32 = arith.constant 0 : i32
    %c0_i32_0 = arith.constant 0 : i32
    %c0_i32_1 = arith.constant 0 : i32
    return %c0_i32, %c0_i32_0 : i32, i32
  }
  func.func @transform_18(%arg0: i32) -> (i32, i32) {
    %c0_i32 = arith.constant 0 : i32
    %c0_i32_0 = arith.constant 0 : i32
    %c0_i32_1 = arith.constant 0 : i32
    return %c0_i32, %c0_i32_0 : i32, i32
  }
  func.func @transform_19(%arg0: i32) -> (i32, i32) {
    %c0_i32 = arith.constant 0 : i32
    %c0_i32_0 = arith.constant 0 : i32
    %c0_i32_1 = arith.constant 0 : i32
    return %c0_i32, %c0_i32_0 : i32, i32
  }
  func.func @transform_20(%arg0: i32) -> (i32, i32) {
    %c0_i32 = arith.constant 0 : i32
    %c0_i32_0 = arith.constant 0 : i32
    %c0_i32_1 = arith.constant 0 : i32
    return %c0_i32, %c0_i32_0 : i32, i32
  }
  func.func @transform_21(%arg0: i32) -> (i32, i32) {
    %c0_i32 = arith.constant 0 : i32
    %c0_i32_0 = arith.constant 0 : i32
    %c0_i32_1 = arith.constant 0 : i32
    return %c0_i32, %c0_i32_0 : i32, i32
  }
  func.func @transform_22(%arg0: i32) -> (i32, i32) {
    %c0_i32 = arith.constant 0 : i32
    %c0_i32_0 = arith.constant 0 : i32
    %c0_i32_1 = arith.constant 0 : i32
    return %c0_i32, %c0_i32_0 : i32, i32
  }
  func.func @transform_23(%arg0: i32) -> (i32, i32) {
    %c0_i32 = arith.constant 0 : i32
    %c0_i32_0 = arith.constant 0 : i32
    %c0_i32_1 = arith.constant 0 : i32
    return %c0_i32, %c0_i32_0 : i32, i32
  }
  func.func @transform_24(%arg0: i32) -> (i32, i32) {
    %c0_i32 = arith.constant 0 : i32
    %c0_i32_0 = arith.constant 0 : i32
    %c0_i32_1 = arith.constant 0 : i32
    return %c0_i32, %c0_i32_0 : i32, i32
  }
  func.func @transform_25(%arg0: i32) -> (i32, i32) {
    %c0_i32 = arith.constant 0 : i32
    %c0_i32_0 = arith.constant 0 : i32
    %c0_i32_1 = arith.constant 0 : i32
    return %c0_i32, %c0_i32_0 : i32, i32
  }
  func.func @transform_26(%arg0: i32) -> (i32, i32, i32) {
    %c0_i32 = arith.constant 0 : i32
    %c0_i32_0 = arith.constant 0 : i32
    %c0_i32_1 = arith.constant 0 : i32
    return %arg0, %c0_i32, %c0_i32_0 : i32, i32, i32
  }
}

</mosaic_0001>

<bundles_post_ra>
// kernel: fwd.1
= control target key start
LH: loop header
LB: loop body
LE: loop exit
PB: predicated region body
PF: predicated region fallthrough
CT: control target
= control target key end

     0   :  { %s3310_s27 = smov 0   ;;  %s3764_s0 = inlined_call_operand.vmem [shape: f32[2,4,16], index: 0, kind: input, shape index: {}]   ;;  %s3765_s1 = inlined_call_operand.vmem [shape: f32[2,1,254], index: 1, kind: input, shape index: {}]   ;;  %s3766_s2 = inlined_call_operand.vmem [shape: bf16[4,12], index: 2, kind: input, shape index: {}]   ;;  %s3767_s3 = inlined_call_operand.vmem [shape: f32[4,1], index: 3, kind: input, shape index: {}]   ;;  %s3768_s4 = inlined_call_operand.vmem [shape: bf16[8,12], index: 4, kind: input, shape index: {}]   ;;  %s3769_s5 = inlined_call_operand.vmem [shape: f32[8,1], index: 5, kind: input, shape index: {}]   ;;  %s3770_s6 = inlined_call_operand.vmem [shape: bf16[16,24], index: 6, kind: input, shape index: {}]   ;;  %s3771_s7 = inlined_call_operand.vmem [shape: f32[16,1], index: 7, kind: input, shape index: {}]   ;;  %s3772_s8 = inlined_call_operand.vmem [shape: bf16[4,9], index: 8, kind: input, shape index: {}]   ;;  %s3773_s9 = inlined_call_operand.vmem [shape: f32[4,1], index: 9, kind: input, shape index: {}]   ;;  %s3774_s10 = inlined_call_operand.vmem [shape: bf16[8,36], index: 10, kind: input, shape index: {}]   ;;  %s3775_s11 = inlined_call_operand.vmem [shape: f32[8,1], index: 11, kind: input, shape index: {}]   ;;  %s3776_s12 = inlined_call_operand.vmem [shape: bf16[16,72], index: 12, kind: input, shape index: {}]   ;;  %s3777_s13 = inlined_call_operand.vmem [shape: f32[16,1], index: 13, kind: input, shape index: {}]   ;;  %s3778_s14 = inlined_call_operand.vmem [shape: bf16[15,8], index: 14, kind: input, shape index: {}]   ;;  %s3779_s15 = inlined_call_operand.vmem [shape: bf16[7,4], index: 15, kind: input, shape index: {}]   ;;  %s3780_s16 = inlined_call_operand.vmem [shape: bf16[16,96], index: 16, kind: input, shape index: {}]   ;;  %s3781_s17 = inlined_call_operand.vmem [shape: f32[16,1], index: 17, kind: input, shape index: {}]   ;;  %s3782_s18 = inlined_call_operand.vmem [shape: bf16[4,8], index: 18, kind: input, shape index: {}]   ;;  %s3783_s19 = inlined_call_operand.vmem [shape: bf16[8,96], index: 19, kind: input, shape index: {}]   ;;  %s3784_s20 = inlined_call_operand.vmem [shape: f32[8,1], index: 20, kind: input, shape index: {}]   ;;  %s3785_s21 = inlined_call_operand.vmem [shape: bf16[8,16], index: 21, kind: input, shape index: {}]   ;;  %s3786_s22 = inlined_call_operand.vmem [shape: bf16[4,48], index: 22, kind: input, shape index: {}]   ;;  %s3787_s23 = inlined_call_operand.vmem [shape: f32[4,1], index: 23, kind: input, shape index: {}]   ;;  %s3788_s24 = inlined_call_operand.vmem [shape: bf16[3,4], index: 24, kind: input, shape index: {}]   ;;  %s3789_s25 = inlined_call_operand.vmem [shape: f32[3,1], index: 25, kind: input, shape index: {}]   ;;  %s3790_s26 = inlined_call_operand.vmem [shape: f32[2,3,16], index: 26, kind: output, shape index: {}]  }
   0x1   :  { %3807 = sst [smem:[#allocation2_spill]] %s3764_s0 }
   0x2   :  { %3808 = sst [smem:[#allocation3_spill]] %s3765_s1 }
   0x3   :  { %3809 = sst [smem:[#allocation4_spill]] %s3766_s2 }
   0x4   :  { %3810 = sst [smem:[#allocation5_spill]] %s3767_s3 }
   0x5   :  { %3811 = sst [smem:[#allocation6_spill]] %s3768_s4 }
   0x6   :  { %3812 = sst [smem:[#allocation7_spill]] %s3769_s5 }
   0x7   :  { %3813 = sst [smem:[#allocation8_spill]] %s3770_s6 }
   0x8   :  { %3814 = sst [smem:[#allocation9_spill]] %s3771_s7 }
   0x9   :  { %3815 = sst [smem:[#allocation10_spill]] %s3772_s8 }
   0xa   :  { %3816 = sst [smem:[#allocation11_spill]] %s3773_s9 }
   0xb   :  { %3817 = sst [smem:[#allocation12_spill]] %s3774_s10 }
   0xc LB: > { %s2653_s3 = sadd.s32 4294967295, %s3128_s27   ;;  %p2657_p0 = scmp.ge.s32.totalorder %s3128_s27, 1  ;;  %s3128_s27 = sphi %s3310_s27, %s36_s27  }
   0xd   : > { %p720_p1 = scmp.lt.s32.totalorder %s3128_s27, 3 }
   0xf   : > { %p721_p2 = pnand %p2657_p0, %p720_p1 }
  0x10   : > { %p792_p3 = scmp.lt.s32.totalorder (!%p721_p2), %s2653_s3, 1  ;;  %s3818_s4 = sld [smem:[#allocation2_spill]] (!%p721_p2) }
  0x11   : > { %724 = sbr.rel (%p721_p2) target bundleno = 5696 (0x1640), region = 124  ;;  %s3130_s0 = smov (!%p721_p2), 1  }
  0x12   : > { %s3805_s9 = smov (!%p721_p2), 126   ;;  %s3819_s5 = sld [smem:[#allocation5_spill]] (!%p721_p2) }
  0x13   : > { %s3135_s10 = smov (!%p721_p2), 127   ;;  %s3820_s28 = sld [smem:[#allocation4_spill]] (!%p721_p2) }
  0x14   : > { %s3822_s8 = sld [smem:[#allocation7_spill]] (!%p721_p2)  ;;  %s3139_s30 = smov (!%p721_p2), 109  }
  0x15   : > { %s3800_s2 = smov (!%p721_p2), 92   ;;  %s3823_s1 = sld [smem:[#allocation6_spill]] (!%p721_p2) }
  0x16   : > { %s3864_s3 = smov (!%p792_p3, %s2653_s3), 1  ;;  %v3131_v1 = vmov 0.0   ;;  %vm3132_vm0 = vmmov 0   ;;  %vm3795_vm1 = vcmask 7168   ;;  %vm3797_vm2 = vcmask 138240   ;;  %v3114_v14 = vld [vmem:[%s3778_s14] sm:$0xff]  }
  0x17   : > { %s3792_s7 = sshll.u32 %s3864_s3, 2  ;;  %2774 = vmatprep.subr.bf16.mxu0 %v3131_v1  ;;  %2780 = vmatprep.subr.bf16.mxu1 %v3131_v1  ;;  %v3133_v3 = vmov 0   ;;  %vm822_vm3 = vcmask 1043456   ;;  %vm836_vm4 = vcmask 1045504   ;;  %vm832_vm5 = vcmask 97280  }
  0x18   : > { %s795_s29 = scalar_lea.vmem %s3818_s4, %s3792_s7  ;;  %2776 = vmatprep.mubr.msk.bf16.mxu0 %vm3132_vm0, %v3131_v1  ;;  %2782 = vmatprep.mubr.msk.bf16.mxu1 %vm3132_vm0, %v3131_v1  ;;  %v826_v7 = vld [vmem:[%s3819_s5] sm:$0xf]  ;;  %vm898_vm6 = vcmask 1046528   ;;  %vm899_vm7 = vcmask 1047552   ;;  %v3136_v15 = vmov 65535   ;;  %vm894_vm8 = vcmask 121856  }
  0x19   : > { %v805_v0 = vld [vmem:[%s795_s29] sm:$0xf]  ;;  %2997 = vset.pattern.permute.xlu1 %v3133_v3  ;;  %2998 = vset.pattern.permute.xlu0 %v3133_v3  ;;  %v900_v16 = vsel %vm898_vm6, 4294967295, %v3136_v15  ;;  %v1160_v33 = vlaneseq  ;;  %s2659_s29 = sshll.u32 %s3864_s3, 1  ;;  %s3821_s5 = sld [smem:[#allocation3_spill]]  ;;  %vm3793_vm9 = vcmask 72704  }
  0x1a   : > { %807 = vrot.lane.b32.xlu0 %v805_v0, %s3130_s0  ;;  %v824_v13 = vld [vmem:[%s3820_s28] sm:$0x3]  ;;  %v901_v17 = vsel %vm899_vm7, %v900_v16, 0  ;;  %s3137_s4 = smov 110   ;;  %s3141_s28 = smov 90   ;;  %vm1027_vm10 = vcmask 1042432  }
  0x1b   : > { %v3356_v18 = vand.u32 %v3114_v14, %v901_v17  ;;  %v1161_v34 = vshrl.u32 %v1160_v33, 7  ;;  %v963_v45 = vld [vmem:[%s3822_s8] sm:$0xff]  ;;  %v1028_v52 = vsel %vm1027_vm10, 4294967295, %v3136_v15  ;;  %vm1174_vm11 = vcmask 1039360   ;;  %s3148_s8 = smov 11   ;;  %s3151_s7 = smov 41  }
  0x1c   : > { %v961_v51 = vld [vmem:[%s3823_s1] sm:$0xf]  ;;  %v1029_v54 = vsel %vm822_vm3, %v1028_v52, 0  ;;  %vm1234_vm12 = vcmask 1040384   ;;  %vm1182_vm13 = vcmask 1031168   ;;  %vm1237_vm14 = vcmask 1041408  }
  0x1d   : > { %2781 = vmatpush3.bf16.msra.mxu1 %v3356_v18  ;;  %v1162_v35 = vsub.s32 0, %v1161_v34  ;;  %v1166_v36 = vsub.s32 1, %v1161_v34  ;;  %v1022_v53 = vld [vmem:[%s3779_s15] sm:$0xf]  ;;  %vm1190_vm15 = vcmask 900096   ;;  %vm1206_vm7 = vcmask 883712  }
  0x1e   : > { %2792 = vmatprep.subr.bf16.mxu1 %v3131_v1  ;;  %v3406_v55 = vand.u32 %v1029_v54, %v1022_v53  ;;  %s3798_s1 = smov 20  }
  0x1f   : > { %s799_s6 = scalar_lea.vmem %s3821_s5, %s2659_s29  ;;  %s3804_s29 = smov 108  }
  0x20   : > { %v1158_v37 = vld [vmem:[%s799_s6] sm:$0x3]  ;;  %s3142_s5 = smov 91   ;;  %s3802_s6 = smov 112  }
  0x21   : > { %v3373_v38 = vrot.slane %v1158_v37, %v1162_v35  ;;  %v3375_v39 = vrot.slane %v1158_v37, %v1166_v36 }
  0x23   : > { %v2999_v44 = vpack.i.bf16 %v3375_v39, %v3373_v38 }
  0x8c   : > { %v808_v2 = vpop.permute.xlu0 %807 }
  0x8d   : > { %v811_v4 = vsel %vm3795_vm1, 0.0, %v808_v2 }
  0x8e   : > { %v813_v5 = vsel %vm3797_vm2, %v811_v4, 0.0  ;;  %vm1708_vm2 = vcmask 564224  }
  0x8f   : > { %819 = vrot.lane.b32.xlu1 %v813_v5, %s3805_s9  ;;  %v815_v6 = vrot.slane %v813_v5, 4 }
  0x91   : > { %816 = vrot.lane.b32.xlu0 %v815_v6, %s3135_s10 }
  0x93   : > { %829 = vperm.xlu1 %2997, %v826_v7  }
 0x101   : > { %v820_v9 = vpop.permute.xlu1 %819 }
 0x103   : > { %v817_v8 = vpop.permute.xlu0 %816 }
 0x104   : > { %v823_v10 = vsel %vm822_vm3, %v813_v5, %v817_v8 }
 0x105   : > { %v825_v11 = vpack.c.bf16 %v820_v9, %v823_v10 }
 0x107   : > { %v838_v12 = vsel %vm836_vm4, %v825_v11, 0 }
 0x108   : > { %2775 = vmatpush3.bf16.msra.mxu0 %v838_v12 }
 0x109   : > { %2786 = vmatprep.subr.bf16.mxu0 %v3131_v1 }
 0x10b   : > { %2777 = vmatmul.mubr.msk.bf16.vlgmr.msra.gmra.mxu0 %vm832_vm5, %v824_v13 }
 0x10c   : > { %2788 = vmatprep.mubr.msk.bf16.mxu0 %vm3132_vm0, %v3131_v1 }
 0x10e   : > { %v830_v19 = vpop.permute.xlu1 %829 }
 0x1cb   : > { %v874_v20 = vpop.f32.mrf.mxu0 }
 0x1cc   : > { %v875_v21 = vadd.f32 %v874_v20, %v830_v19 }
 0x1cd   : > { %v2778_v22 = vpop.f32.mrf.mxu0 }
 0x1ce   : > { %v3360_v23 = vmax.f32 %v875_v21, 0.0 }
 0x1cf   : > { %v877_v24 = vpop.f32.mrf.mxu0 }
 0x1d0   : > { %882 = vrot.lane.b32.xlu0 %v3360_v23, %s3135_s10 }
 0x1d1   : > { %v2779_v25 = vpop.f32.mrf.mxu0 }
 0x242   : > { %v883_v26 = vpop.permute.xlu0 %882 }
 0x243   : > { %v885_v27 = vmax.f32 %v3360_v23, %v883_v26 }
 0x245   : > { %v886_v28 = vpack.c.bf16 %v885_v27, %v885_v27 }
 0x247   : > { %2783 = vmatmul.mubr.msk.bf16.vlgmr.msra.gmra.mxu1 %vm894_vm8, %v886_v28 }
 0x248   : > { %2794 = vmatprep.mubr.msk.bf16.mxu1 %vm3132_vm0, %v3131_v1  ;;  %2793 = vmatpush3.bf16.msra.mxu1 %v3406_v55 }
 0x307   : > { %v939_v29 = vpop.f32.mrf.mxu1 }
 0x308   : > { %946 = vrot.lane.b32.xlu1 %v939_v29, %s3130_s0 }
 0x309   : > { %v2784_v30 = vpop.f32.mrf.mxu1 }
 0x30b   : > { %v942_v31 = vpop.f32.mrf.mxu1 }
 0x30d   : > { %v2785_v32 = vpop.f32.mrf.mxu1 }
 0x37a   : > { %v947_v40 = vpop.permute.xlu1 %946 }
 0x37b   : > { %v949_v41 = vsel %vm3795_vm1, 0.0, %v947_v40 }
 0x37c   : > { %v951_v42 = vsel %vm3793_vm9, %v949_v41, 0.0 }
 0x37d   : > { %957 = vrot.lane.b32.xlu1 %v951_v42, %s3805_s9  ;;  %v953_v43 = vrot.slane %v951_v42, 4 }
 0x37f   : > { %954 = vrot.lane.b32.xlu0 %v953_v43, %s3135_s10 }
 0x381   : > { %3000 = vrot.lane.b32.xlu1 %v2999_v44, %s3135_s10 }
 0x383   : > { %966 = vperm.xlu0 %2998, %v963_v45  }
 0x385   : > { %3005 = vrot.lane.b32.xlu1 %v2999_v44, %s3805_s9 }
 0x387   : > { %3010 = vrot.lane.b32.xlu0 %v2999_v44, %s3137_s4 }
 0x389   : > { %3020 = vrot.lane.b32.xlu1 %v2999_v44, %s3804_s29 }
 0x38b   : > { %3015 = vrot.lane.b32.xlu0 %v2999_v44, %s3139_s30  ;;  %s3149_s30 = smov 21  }
 0x38f   : > { %3025 = vrot.lane.b32.xlu0 %v2999_v44, %s3800_s2 }
 0x393   : > { %3035 = vrot.lane.b32.xlu0 %v2999_v44, %s3141_s28  ;;  %s3824_s28 = sld [smem:[#allocation11_spill]] }
 0x399   : > { %v1254_v63 = vld [vmem:[%s3824_s28] sm:$0xf]  ;;  %s3801_s28 = smov 76  }
 0x3ef   : > { %v958_v47 = vpop.permute.xlu1 %957 }
 0x3f1   : > { %v955_v46 = vpop.permute.xlu0 %954 }
 0x3f2   : > { %v960_v48 = vsel %vm822_vm3, %v951_v42, %v955_v46  ;;  %v1263_v46 = vsel %vm822_vm3, 4294967295, %v3136_v15 }
 0x3f3   : > { %v962_v49 = vpack.c.bf16 %v958_v47, %v960_v48  ;;  %v3001_v0 = vpop.permute.xlu1 %3000 }
 0x3f4   : > { %v3003_v4 = vunpack.i.h.bf16 %v3001_v0  ;;  %v3002_v5 = vunpack.i.l.bf16 %v3001_v0 }
 0x3f5   : > { %v973_v50 = vsel %vm836_vm4, %v962_v49, 0 }
 0x3f6   : > { %2787 = vmatpush3.bf16.msra.mxu0 %v973_v50  ;;  %v1175_v9 = vsel %vm1174_vm11, %v3002_v5, %v3003_v4  ;;  %v1236_v11 = vsel %vm1234_vm12, %v3375_v39, %v3003_v4  ;;  %vm1244_vm11 = vcmask 1044480  }
 0x3f7   : > { %2798 = vmatprep.subr.bf16.mxu0 %v3131_v1  ;;  %v3006_v6 = vpop.permute.xlu1 %3005  ;;  %v1235_v14 = vsel %vm1234_vm12, %v3373_v38, %v1175_v9  ;;  %vm1214_vm12 = vcmask 752640   ;;  %v1264_v54 = vsel %vm1244_vm11, %v1263_v46, 0 }
 0x3f8   : > { %v3008_v7 = vunpack.i.h.bf16 %v3006_v6  ;;  %v3007_v8 = vunpack.i.l.bf16 %v3006_v6 }
 0x3f9   : > { %2789 = vmatmul.mubr.msk.bf16.vlgmr.msra.gmra.mxu0 %vm832_vm5, %v961_v51  ;;  %vm1198_vm5 = vcmask 891904  }
 0x3fa   : > { %2802 = vmatprep.mubr.msk.bf16.mxu0 %vm3132_vm0, %v3131_v1  ;;  %v1183_v16 = vsel %vm1182_vm13, %v3007_v8, %v3008_v7  ;;  %v1239_v17 = vsel %vm1237_vm14, %v1236_v11, %v3008_v7  ;;  %vm1023_vm13 = vcmask 56320  }
 0x3fb   : > { %v3021_v21 = vpop.permute.xlu1 %3020  ;;  %v1238_v24 = vsel %vm1237_vm14, %v1235_v14, %v1183_v16 }
 0x3fc   : > { %v3023_v27 = vunpack.i.h.bf16 %v3021_v21  ;;  %v3022_v28 = vunpack.i.l.bf16 %v3021_v21 }
 0x3fe   : > { %v967_v56 = vpop.permute.xlu0 %966  ;;  %v1207_v37 = vsel %vm1206_vm7, %v3022_v28, %v3023_v27  ;;  %vm1108_vm7 = vcmask 195584  }
 0x402   : > { %v3011_v2 = vpop.permute.xlu0 %3010 }
 0x403   : > { %v3013_v12 = vunpack.i.h.bf16 %v3011_v2  ;;  %v3012_v13 = vunpack.i.l.bf16 %v3011_v2 }
 0x405   : > { %v1191_v22 = vsel %vm1190_vm15, %v3012_v13, %v3013_v12  ;;  %v1241_v26 = vsel %vm1027_vm10, %v1239_v17, %v3013_v12 }
 0x406   : > { %v3016_v10 = vpop.permute.xlu0 %3015  ;;  %v1240_v30 = vsel %vm1027_vm10, %v1238_v24, %v1191_v22  ;;  %vm1230_vm10 = vcmask 736256  }
 0x407   : > { %v3018_v19 = vunpack.i.h.bf16 %v3016_v10  ;;  %v3017_v20 = vunpack.i.l.bf16 %v3016_v10 }
 0x409   : > { %v1199_v29 = vsel %vm1198_vm5, %v3017_v20, %v3018_v19  ;;  %v1243_v32 = vsel %vm822_vm3, %v1241_v26, %v3018_v19  ;;  %vm1222_vm5 = vcmask 744448  }
 0x40a   : > { %v3026_v25 = vpop.permute.xlu0 %3025  ;;  %v1242_v36 = vsel %vm822_vm3, %v1240_v30, %v1199_v29  ;;  %v1246_v41 = vsel %vm1244_vm11, %v1243_v32, %v3023_v27 }
 0x40b   : > { %v3028_v33 = vunpack.i.h.bf16 %v3026_v25  ;;  %v3027_v34 = vunpack.i.l.bf16 %v3026_v25  ;;  %v1245_v43 = vsel %vm1244_vm11, %v1242_v36, %v1207_v37  ;;  %vm1688_vm11 = vcmask 154624  }
 0x40d   : > { %v1248_v49 = vsel %vm836_vm4, %v1246_v41, %v3028_v33 }
 0x40e   : > { %v3036_v31 = vpop.permute.xlu0 %3035 }
 0x40f   : > { %v3038_v39 = vunpack.i.h.bf16 %v3036_v31  ;;  %v3037_v40 = vunpack.i.l.bf16 %v3036_v31 }
 0x411   : > { %v1231_v50 = vsel %vm1230_vm10, %v3037_v40, %v3038_v39  ;;  %vm1692_vm10 = vcmask 236544  }
 0x4b9   : > { %v1009_v57 = vpop.f32.mrf.mxu0 }
 0x4ba   : > { %v1010_v58 = vadd.f32 %v1009_v57, %v967_v56 }
 0x4bb   : > { %v2790_v59 = vpop.f32.mrf.mxu0 }
 0x4bc   : > { %v3409_v60 = vmax.f32 %v1010_v58, 0.0 }
 0x4bd   : > { %v1012_v61 = vpop.f32.mrf.mxu0 }
 0x4be   : > { %1017 = vrot.lane.b32.xlu1 %v3409_v60, %s3135_s10 }
 0x4bf   : > { %v2791_v62 = vpop.f32.mrf.mxu0 }
 0x4c2   : > { %3030 = vrot.lane.b32.xlu1 %v2999_v44, %s3142_s5  ;;  %v1215_v44 = vsel %vm1214_vm12, %v3027_v34, %v3028_v33  ;;  %s3825_s5 = sld [smem:[#allocation10_spill]]  ;;  %vm1690_vm12 = vcmask 171008  }
 0x4c3   : > { %v1247_v51 = vsel %vm836_vm4, %v1245_v43, %v1215_v44  ;;  %vm3794_vm4 = vcmask 39936  }
 0x4c6   : > { %1257 = vperm.xlu1 %2997, %v1254_v63  }
 0x4c8   : > { %v1251_v61 = vld [vmem:[%s3825_s5] sm:$0x3]  ;;  %s3826_s5 = sld [smem:[#allocation8_spill]] }
 0x530   : > { %v1018_v35 = vpop.permute.xlu1 %1017 }
 0x531   : > { %v1020_v38 = vmax.f32 %v3409_v60, %v1018_v35 }
 0x533   : > { %v1021_v42 = vpack.c.bf16 %v1020_v38, %v1020_v38  ;;  %v3115_v38 = vld [vmem:[%s3826_s5] sm:$0xff]   ;;  %s3150_s5 = smov 31  }
 0x534   : > { %v3031_v45 = vpop.permute.xlu1 %3030 }
 0x535   : > { %v3033_v47 = vunpack.i.h.bf16 %v3031_v45  ;;  %v3032_v48 = vunpack.i.l.bf16 %v3031_v45  ;;  %2795 = vmatmul.mubr.msk.bf16.vlgmr.msra.gmra.mxu1 %vm1023_vm13, %v1021_v42 }
 0x536   : > { %1303 = vmatprep.mubr.bf16.mxu1 %v3133_v3 }
 0x537   : > { %v1223_v52 = vsel %vm1222_vm5, %v3032_v48, %v3033_v47  ;;  %v1250_v53 = vsel %vm898_vm6, %v1248_v49, %v3033_v47  ;;  %vm1694_vm5 = vcmask 252928  }
 0x538   : > { %v1249_v56 = vsel %vm898_vm6, %v1247_v51, %v1223_v52  ;;  %v1253_v57 = vpack.c.bf16 %v3038_v39, %v1250_v53  ;;  %vm3796_vm6 = vmmov 1  }
 0x539   : > { %v1252_v15 = vpack.c.bf16 %v1231_v50, %v1249_v56 }
 0x53a   : > { %v1269_v58 = vand.u32 %v1264_v54, %v1253_v57 }
 0x53b   : > { %v1266_v59 = vand.u32 %v1264_v54, %v1252_v15 }
 0x53c   : > { %1285 = vmatprep.subr.bf16.mxu1 %v1269_v58 }
 0x53d   : > { %1286 = vmatpush1.bf16.msra.mxu1 %v1266_v59 }
 0x53e   : > { %2812 = vmatprep.subr.bf16.mxu1 %v3131_v1 }
 0x540   : > { %2671 = vmatmul.mubr.msk.bf16.vlgmr.msra.gmra.mxu1 %vm3793_vm9, %v1251_v61  ;;  %vm1700_vm9 = vcmask 400384  }
 0x541   : > { %2813 = vmatpush3.bf16.msra.mxu1 %v3356_v18  ;;  %2814 = vmatprep.mubr.msk.bf16.mxu1 %vm3132_vm0, %v3131_v1  ;;  %v1258_v2 = vpop.permute.xlu1 %1257 }
 0x542   : > { %2824 = vmatprep.subr.bf16.mxu1 %v3131_v1 }
 0x5f5   : > { %v1067_v3 = vpop.f32.mrf.mxu1 }
 0x5f7   : > { %v2796_v62 = vpop.f32.mrf.mxu1 }
 0x5f9   : > { %v1070_v63 = vpop.f32.mrf.mxu1 }
 0x5fb   : > { %v2797_v0 = vpop.f32.mrf.mxu1 }
 0x600   : > { %v1305_v4 = vpop.f32.mrf.mxu1 }
 0x601   : > { %v1306_v5 = vadd.f32 %v1305_v4, %v1258_v2 }
 0x602   : > { %v1307_v6 = vpop.f32.mrf.mxu1 }
 0x603   : > { %v3446_v7 = vmax.f32 %v1306_v5, 0.0  ;;  %v1308_v8 = vadd.f32 %v1307_v6, %v1258_v2 }
 0x604   : > { %v1309_v9 = vpop.f32.mrf.mxu1 }
 0x605   : > { %v3448_v10 = vmax.f32 %v1308_v8, 0.0  ;;  %1315 = vrot.lane.b32.xlu0 %v3446_v7, %s3137_s4 }
 0x606   : > { %v1310_v11 = vpop.f32.mrf.mxu1 }
 0x607   : > { %1506 = vrot.lane.b32.xlu1 %v3448_v10, %s3137_s4  ;;  %s3799_s4 = smov 56  }
 0x609   : > { %1074 = vrot.lane.b32.xlu0 %v1067_v3, %s3130_s0 }
 0x677   : > { %v3455_v12 = vpop.permute.xlu0 %1315 }
 0x678   : > { %v1365_v13 = vmax.f32 %v3446_v7, %v3455_v12 }
 0x679   : > { %v1507_v14 = vpop.permute.xlu1 %1506 }
 0x67a   : > { %v1508_v16 = vsel %vm1190_vm15, %v3455_v12, %v1507_v14  ;;  %1367 = vrot.lane.b32.xlu1 %v1365_v13, %s3135_s10  ;;  %v1564_v20 = vmax.f32 %v3448_v10, %v1507_v14  ;;  %vm2667_vm15 = vmpackc.low %vm3796_vm6, %vm3794_vm4  ;;  %vm1706_vm6 = vcmask 498688  }
 0x67b   : > { %v1510_v17 = vmax.f32 %v3446_v7, %v1508_v16  ;;  %v1075_v19 = vpop.permute.xlu0 %1074 }
 0x67c   : > { %v1077_v21 = vsel %vm3795_vm1, 0.0, %v1075_v19  ;;  %vm1704_vm1 = vcmask 482304  }
 0x67d   : > { %1512 = vrot.lane.b32.xlu0 %v1510_v17, %s3135_s10  ;;  %v1079_v22 = vsel %vm3794_vm4, %v1077_v21, 0.0  ;;  %vm1702_vm4 = vcmask 416768  }
 0x67e   : > { %1566 = vrot.lane.b32.xlu1 %v1564_v20, %s3135_s10 }
 0x681   : > { %1084 = vrot.lane.b32.xlu0 %v1079_v22, %s3805_s9 }
 0x682   : > { %1081 = vrot.lane.b32.xlu1 %v1079_v22, %s3135_s10 }
 0x6ec   : > { %v1368_v24 = vpop.permute.xlu1 %1367 }
 0x6ed   : > { %v1370_v25 = vmax.f32 %v1365_v13, %v1368_v24 }
 0x6ef   : > { %v1371_v26 = vpack.c.bf16 %v1370_v25, %v1370_v25  ;;  %v1513_v27 = vpop.permute.xlu0 %1512 }
 0x6f0   : > { %v1515_v28 = vmax.f32 %v1510_v17, %v1513_v27  ;;  %v1567_v29 = vpop.permute.xlu1 %1566 }
 0x6f1   : > { %v1569_v30 = vmax.f32 %v1564_v20, %v1567_v29  ;;  %1461 = vrot.lane.b32.xlu1 %v1371_v26, %s3799_s4  ;;  %1416 = vrot.lane.b32.xlu0 %v1371_v26, %s3800_s2  ;;  %s3162_s2 = smov 19   ;;  %s3163_s4 = smov 114  }
 0x6f2   : > { %v1516_v31 = vpack.c.bf16 %v1515_v28, %v1515_v28 }
 0x6f3   : > { %v1570_v32 = vpack.c.bf16 %v1569_v30, %v1569_v30  ;;  %v1085_v33 = vpop.permute.xlu0 %1084 }
 0x6f4   : > { %v1090_v34 = vpack.c.bf16 %v1085_v33, %v1085_v33  ;;  %v1082_v36 = vpop.permute.xlu1 %1081 }
 0x6f5   : > { %1572 = vrot.lane.b32.xlu1 %v1570_v32, %s3802_s6  ;;  %1518 = vrot.lane.b32.xlu0 %v1516_v31, %s3798_s1  ;;  %v2668_v37 = vpack.c.bf16 %v1082_v36, %v1077_v21  ;;  %s3158_s1 = smov 118   ;;  %s3835_s6 = smov 126  }
 0x6f6   : > { %v1113_v35 = vsel %vm822_vm3, %v1090_v34, 0  ;;  %v1744_v34 = vld [vmem:[%s3775_s11] sm:$0xff] }
 0x6f7   : > { %2799 = vmatpush3.bf16.msra.mxu0 %v1113_v35 }
 0x6f8   : > { %2800 = vmatprep.subr.bf16.mxu0 %v3131_v1 }
 0x6f9   : > { %1617 = vrot.lane.b32.xlu0 %v1570_v32, %s3801_s28  ;;  %s3848_s28 = smov 76  }
 0x6fb   : > { %2801 = vmatpush3.bf16.msk.msra.mxu0 %vm2667_vm15, %v2668_v37  ;;  %vm1696_vm15 = vcmask 318464  }
 0x6fc   : > { %2806 = vmatprep.subr.bf16.mxu0 %v3131_v1 }
 0x6fe   : > { %2803 = vmatmul.mubr.msk.bf16.vlgmr.msra.gmra.mxu0 %vm1108_vm7, %v3115_v38  ;;  %vm1698_vm7 = vcmask 334848  }
 0x6ff   : > { %2807 = vmatpush3.bf16.msra.mxu0 %v3356_v18  ;;  %2808 = vmatprep.mubr.msk.bf16.mxu0 %vm3132_vm0, %v3131_v1 }
 0x700   : > { %2818 = vmatprep.subr.bf16.mxu0 %v3131_v1 }
 0x706   : > { %2809 = vmatmul.mubr.msk.bf16.vlgmr.msra.gmra.mxu0 %vm894_vm8, %v1371_v26 }
 0x707   : > { %2819 = vmatpush3.bf16.msra.mxu0 %v3356_v18  ;;  %2820 = vmatprep.mubr.msk.bf16.mxu0 %vm3132_vm0, %v3131_v1 }
 0x708   : > { %2830 = vmatprep.subr.bf16.mxu0 %v3131_v1 }
 0x763   : > { %v1462_v39 = vpop.permute.xlu1 %1461  ;;  %v1417_v40 = vpop.permute.xlu0 %1416 }
 0x764   : > { %2815 = vmatmul.mubr.msk.bf16.vlgmr.msra.gmra.mxu1 %vm894_vm8, %v1417_v40  ;;  %2821 = vmatmul.mubr.msk.bf16.vlgmr.msra.gmra.mxu0 %vm894_vm8, %v1462_v39 }
 0x765   : > { %2825 = vmatpush3.bf16.msra.mxu1 %v3356_v18  ;;  %2831 = vmatpush3.bf16.msra.mxu0 %v3356_v18 }
 0x766   : > { %2826 = vmatprep.mubr.msk.bf16.mxu1 %vm3132_vm0, %v3131_v1  ;;  %2832 = vmatprep.mubr.msk.bf16.mxu0 %vm3132_vm0, %v3131_v1 }
 0x767   : > { %2836 = vmatprep.subr.bf16.mxu1 %v3131_v1  ;;  %2842 = vmatprep.subr.bf16.mxu0 %v3131_v1  ;;  %v1573_v41 = vpop.permute.xlu1 %1572  ;;  %v1519_v42 = vpop.permute.xlu0 %1518 }
 0x76b   : > { %v1618_v43 = vpop.permute.xlu0 %1617 }
 0x76c   : > { %2827 = vmatmul.mubr.msk.bf16.vlgmr.msra.gmra.mxu1 %vm894_vm8, %v1519_v42  ;;  %2833 = vmatmul.mubr.msk.bf16.vlgmr.msra.gmra.mxu0 %vm894_vm8, %v1573_v41 }
 0x76d   : > { %2837 = vmatpush3.bf16.msra.mxu1 %v3356_v18  ;;  %2838 = vmatprep.mubr.msk.bf16.mxu1 %vm3132_vm0, %v3131_v1 }
 0x76e   : > { %2848 = vmatprep.mubr.msk.bf16.mxu0 %vm3132_vm0, %v3131_v1  ;;  %2852 = vmatprep.subr.bf16.mxu1 %v3131_v1 }
 0x774   : > { %2839 = vmatmul.mubr.msk.bf16.vlgmr.msra.gmra.mxu1 %vm894_vm8, %v1618_v43  ;;  %vm1686_vm8 = vcmask 89088  }
 0x775   : > { %2853 = vmatpush3.bf16.msra.mxu1 %v3406_v55  ;;  %2854 = vmatprep.mubr.msk.bf16.mxu1 %vm3132_vm0, %v3131_v1 }
 0x776   : > { %2858 = vmatprep.subr.bf16.mxu1 %v3131_v1 }
 0x7be   : > { %v3515_v44 = vpop.f32.mrf.mxu0 }
 0x7c0   : > { %v2804_v18 = vpop.f32.mrf.mxu0 }
 0x7c2   : > { %v3517_v45 = vpop.f32.mrf.mxu0 }
 0x7c4   : > { %v2805_v46 = vpop.f32.mrf.mxu0 }
 0x7c6   : > { %v1409_v47 = vpop.f32.mrf.mxu0 }
 0x7c7   : > { %1663 = vrot.lane.b32.xlu1 %v1409_v47, %s3148_s8  ;;  %s3152_s8 = smov 51  }
 0x7c8   : > { %v2810_v48 = vpop.f32.mrf.mxu0 }
 0x7ca   : > { %v1412_v49 = vpop.f32.mrf.mxu0 }
 0x7cc   : > { %v2811_v50 = vpop.f32.mrf.mxu0 }
 0x824   : > { %v1455_v51 = vpop.f32.mrf.mxu1  ;;  %v1500_v52 = vpop.f32.mrf.mxu0 }
 0x825   : > { %1667 = vrot.lane.b32.xlu0 %v1455_v51, %s3149_s30  ;;  %1671 = vrot.lane.b32.xlu1 %v1500_v52, %s3150_s5  ;;  %s3153_s30 = smov 61   ;;  %s3155_s5 = smov 106  }
 0x826   : > { %v2816_v53 = vpop.f32.mrf.mxu1  ;;  %v2822_v54 = vpop.f32.mrf.mxu0 }
 0x828   : > { %v1458_v56 = vpop.f32.mrf.mxu1  ;;  %v1503_v57 = vpop.f32.mrf.mxu0 }
 0x82a   : > { %v2817_v15 = vpop.f32.mrf.mxu1  ;;  %v2823_v58 = vpop.f32.mrf.mxu0 }
 0x82c   : > { %v1557_v59 = vpop.f32.mrf.mxu1  ;;  %v1611_v61 = vpop.f32.mrf.mxu0 }
 0x82d   : > { %1675 = vrot.lane.b32.xlu0 %v1557_v59, %s3151_s7  ;;  %1679 = vrot.lane.b32.xlu1 %v1611_v61, %s3152_s8  ;;  %s3154_s7 = smov 117   ;;  %s3156_s8 = smov 116  }
 0x82e   : > { %v2828_v3 = vpop.f32.mrf.mxu1  ;;  %v2834_v62 = vpop.f32.mrf.mxu0 }
 0x830   : > { %v1560_v63 = vpop.f32.mrf.mxu1  ;;  %v1614_v0 = vpop.f32.mrf.mxu0 }
 0x832   : > { %v2829_v2 = vpop.f32.mrf.mxu1  ;;  %v2835_v4 = vpop.f32.mrf.mxu0 }
 0x834   : > { %v1656_v5 = vpop.f32.mrf.mxu1 }
 0x835   : > { %1683 = vrot.lane.b32.xlu0 %v1656_v5, %s3153_s30  ;;  %s3157_s30 = smov 107  }
 0x836   : > { %v2840_v6 = vpop.f32.mrf.mxu1 }
 0x838   : > { %v1659_v8 = vpop.f32.mrf.mxu1 }
 0x839   : > { %v1664_v11 = vpop.permute.xlu1 %1663 }
 0x83a   : > { %v2841_v9 = vpop.f32.mrf.mxu1  ;;  %v1687_v13 = vsel %vm1686_vm8, 0.0, %v1664_v11 }
 0x83b   : > { %v1689_v14 = vsel %vm1688_vm11, %v1687_v13, 0.0 }
 0x897   : > { %v1668_v16 = vpop.permute.xlu0 %1667  ;;  %v1672_v20 = vpop.permute.xlu1 %1671 }
 0x898   : > { %v1691_v17 = vsel %vm1690_vm12, %v1689_v14, %v1668_v16 }
 0x899   : > { %v1693_v19 = vsel %vm1692_vm10, %v1691_v17, 0.0  ;;  %vm3833_vm10 = vcmask 39936  }
 0x89a   : > { %v1695_v21 = vsel %vm1694_vm5, %v1693_v19, %v1672_v20  ;;  %vm3834_vm5 = vmmov %vm3833_vm10 }
 0x89b   : > { %v1697_v22 = vsel %vm1696_vm15, %v1695_v21, 0.0 }
 0x89f   : > { %v1676_v24 = vpop.permute.xlu0 %1675  ;;  %v1680_v27 = vpop.permute.xlu1 %1679 }
 0x8a0   : > { %v1699_v25 = vsel %vm1698_vm7, %v1697_v22, %v1676_v24 }
 0x8a1   : > { %v1701_v26 = vsel %vm1700_vm9, %v1699_v25, 0.0  ;;  %vm1979_vm9 = vcmask 187392  }
 0x8a2   : > { %v1703_v28 = vsel %vm1702_vm4, %v1701_v26, %v1680_v27  ;;  %vm3828_vm4 = vcmask 138240  }
 0x8a3   : > { %v1705_v29 = vsel %vm1704_vm1, %v1703_v28, 0.0  ;;  %vm1750_vm1 = vcmask 293888  }
 0x8a7   : > { %v1684_v30 = vpop.permute.xlu0 %1683 }
 0x8a8   : > { %v1707_v31 = vsel %vm1706_vm6, %v1705_v29, %v1684_v30 }
 0x8a9   : > { %v1709_v32 = vsel %vm1708_vm2, %v1707_v31, 0.0  ;;  %vm1975_vm2 = vcmask 105472   ;;  %v2014_v31 = vld [vmem:[%s3777_s13 + $0x8] sm:$0xff] }
 0x8aa   : > { %1721 = vrot.lane.b32.xlu0 %v1709_v32, %s3154_s7  ;;  %1733 = vrot.lane.b32.xlu1 %v1709_v32, %s3155_s5  ;;  %v1711_v33 = vrot.slane %v1709_v32, 4  ;;  %s3827_s7 = sld [smem:[#allocation12_spill]]  ;;  %s3803_s5 = smov 88  }
 0x8ae   : > { %1727 = vrot.lane.b32.xlu0 %v1709_v32, %s3804_s29  ;;  %1724 = vrot.lane.b32.xlu1 %v1711_v33, %s3156_s8 }
 0x8b0   : > { %v1740_v52 = vld [vmem:[%s3827_s7] sm:$0xf]  ;;  %s3164_s7 = smov 121  }
 0x8b2   : > { %1712 = vrot.lane.b32.xlu0 %v1711_v33, %s3135_s10  ;;  %1730 = vrot.lane.b32.xlu1 %v1711_v33, %s3157_s30  ;;  %s3161_s30 = smov 13  }
 0x8b6   : > { %1718 = vrot.lane.b32.xlu0 %v1711_v33, %s3158_s1  ;;  %1715 = vrot.lane.b32.xlu1 %v1709_v32, %s3805_s9 }
 0x8ba   : > { %1747 = vperm.xlu1 %2997, %v1744_v34  }
 0x91c   : > { %v1722_v35 = vpop.permute.xlu0 %1721  ;;  %v1734_v36 = vpop.permute.xlu1 %1733 }
 0x91d   : > { %v1743_v37 = vpack.c.bf16 %v1734_v36, %v1734_v36 }
 0x91f   : > { %v1755_v38 = vsel %vm1237_vm14, %v1743_v37, 0 }
 0x920   : > { %v1728_v39 = vpop.permute.xlu0 %1727  ;;  %2843 = vmatpush3.bf16.msra.mxu0 %v1755_v38  ;;  %v1725_v40 = vpop.permute.xlu1 %1724 }
 0x921   : > { %2844 = vmatprep.subr.bf16.mxu0 %v3131_v1  ;;  %v1738_v43 = vsel %vm822_vm3, %v1722_v35, %v1725_v40 }
 0x924   : > { %v1713_v41 = vpop.permute.xlu0 %1712  ;;  %v1731_v42 = vpop.permute.xlu1 %1730 }
 0x925   : > { %v1739_v18 = vsel %vm822_vm3, %v1728_v39, %v1731_v42  ;;  %v1736_v49 = vsel %vm822_vm3, %v1709_v32, %v1713_v41  ;;  %v2013_v32 = vld [vmem:[%s3777_s13] sm:$0xff] }
 0x926   : > { %v1742_v46 = vpack.c.bf16 %v1739_v18, %v1738_v43 }
 0x928   : > { %v1719_v47 = vpop.permute.xlu0 %1718  ;;  %2845 = vmatpush3.bf16.msra.mxu0 %v1742_v46  ;;  %v1716_v48 = vpop.permute.xlu1 %1715 }
 0x929   : > { %v1737_v50 = vsel %vm822_vm3, %v1716_v48, %v1719_v47  ;;  %2846 = vmatprep.subr.bf16.mxu0 %v3131_v1 }
 0x92a   : > { %v1741_v51 = vpack.c.bf16 %v1737_v50, %v1736_v49  ;;  %v3116_v50 = vld [vmem:[%s3776_s12] sm:$0xff]  }
 0x92c   : > { %2847 = vmatpush3.bf16.msra.mxu0 %v1741_v51 }
 0x92d   : > { %2864 = vmatprep.subr.bf16.mxu0 %v3131_v1 }
 0x92f   : > { %2849 = vmatmul.mubr.msk.bf16.vlgmr.msra.gmra.mxu0 %vm1750_vm1, %v1740_v52  ;;  %vm3840_vm1 = vmmov %vm3834_vm5 }
 0x930   : > { %2865 = vmatpush3.bf16.msra.mxu0 %v3406_v55  ;;  %2866 = vmatprep.mubr.msk.bf16.mxu0 %vm3132_vm0, %v3131_v1 }
 0x931   : > { %2884 = vmatprep.subr.bf16.mxu0 %v3131_v1 }
 0x935   : > { %v1748_v53 = vpop.permute.xlu1 %1747 }
 0x9ef   : > { %v1791_v54 = vpop.f32.mrf.mxu0 }
 0x9f0   : > { %v1792_v56 = vadd.f32 %v1791_v54, %v1748_v53 }
 0x9f1   : > { %v2850_v57 = vpop.f32.mrf.mxu0 }
 0x9f2   : > { %v3544_v15 = vmax.f32 %v1792_v56, 0.0 }
 0x9f3   : > { %v1794_v58 = vpop.f32.mrf.mxu0 }
 0x9f4   : > { %1799 = vrot.lane.b32.xlu0 %v3544_v15, %s3158_s1  ;;  %s3160_s1 = smov 7  }
 0x9f5   : > { %v2851_v59 = vpop.f32.mrf.mxu0 }
 0xa66   : > { %v3548_v61 = vpop.permute.xlu0 %1799 }
 0xa67   : > { %v1820_v3 = vmax.f32 %v3544_v15, %v3548_v61 }
 0xa69   : > { %1822 = vrot.lane.b32.xlu1 %v1820_v3, %s3135_s10 }
 0xadb   : > { %v1823_v62 = vpop.permute.xlu1 %1822 }
 0xadc   : > { %v1825_v63 = vmax.f32 %v1820_v3, %v1823_v62 }
 0xade   : > { %v1826_v0 = vpack.c.bf16 %v1825_v63, %v1825_v63 }
 0xae0   : > { %1916 = vrot.lane.b32.xlu1 %v1826_v0, %s3803_s5  ;;  %1871 = vrot.lane.b32.xlu0 %v1826_v0, %s3804_s29  ;;  %s3836_s5 = smov 108   ;;  %s3847_s29 = smov 112  }
 0xae1   : > { %2855 = vmatmul.mubr.msk.bf16.vlgmr.msra.gmra.mxu1 %vm1023_vm13, %v1826_v0 }
 0xae2   : > { %2859 = vmatpush3.bf16.msra.mxu1 %v3406_v55  ;;  %2860 = vmatprep.mubr.msk.bf16.mxu1 %vm3132_vm0, %v3131_v1 }
 0xae3   : > { %2870 = vmatprep.subr.bf16.mxu1 %v3131_v1 }
 0xb52   : > { %v1917_v2 = vpop.permute.xlu1 %1916  ;;  %v1872_v4 = vpop.permute.xlu0 %1871 }
 0xb53   : > { %2861 = vmatmul.mubr.msk.bf16.vlgmr.msra.gmra.mxu1 %vm1023_vm13, %v1872_v4  ;;  %2867 = vmatmul.mubr.msk.bf16.vlgmr.msra.gmra.mxu0 %vm1023_vm13, %v1917_v2 }
 0xb54   : > { %2880 = vmatprep.mubr.msk.bf16.mxu1 %vm3132_vm0, %v3131_v1  ;;  %2896 = vmatprep.mubr.msk.bf16.mxu0 %vm3132_vm0, %v3131_v1 }
 0xba1   : > { %v1864_v5 = vpop.f32.mrf.mxu1 }
 0xba2   : > { %1962 = vrot.lane.b32.xlu0 %v1864_v5, %s3160_s1  ;;  %s3165_s1 = smov 115  }
 0xba3   : > { %v2856_v55 = vpop.f32.mrf.mxu1 }
 0xba5   : > { %v1867_v6 = vpop.f32.mrf.mxu1 }
 0xba7   : > { %v2857_v8 = vpop.f32.mrf.mxu1 }
 0xc13   : > { %v1910_v9 = vpop.f32.mrf.mxu1  ;;  %v1955_v11 = vpop.f32.mrf.mxu0 }
 0xc14   : > { %1966 = vrot.lane.b32.xlu1 %v1910_v9, %s3161_s30  ;;  %1970 = vrot.lane.b32.xlu0 %v1955_v11, %s3162_s2  ;;  %v1963_v21 = vpop.permute.xlu0 %1962  ;;  %s3166_s30 = smov 120   ;;  %s3167_s2 = smov 122  }
 0xc15   : > { %v2862_v13 = vpop.f32.mrf.mxu1  ;;  %v2868_v14 = vpop.f32.mrf.mxu0  ;;  %v1973_v22 = vsel %vm1023_vm13, 0.0, %v1963_v21  ;;  %vm3830_vm13 = vmmov 1  }
 0xc16   : > { %v1974_v24 = vsel %vm1686_vm8, %v1973_v22, 0.0  ;;  %vm2683_vm6 = vmpackc.low %vm3830_vm13, %vm1979_vm9  ;;  %vm2030_vm8 = vcmask 588800   ;;  %vm2177_vm13 = vcmask 785408  }
 0xc17   : > { %v1913_v16 = vpop.f32.mrf.mxu1  ;;  %v1958_v17 = vpop.f32.mrf.mxu0 }
 0xc19   : > { %v2863_v19 = vpop.f32.mrf.mxu1  ;;  %v2869_v20 = vpop.f32.mrf.mxu0 }
 0xc86   : > { %v1967_v25 = vpop.permute.xlu1 %1966  ;;  %v1971_v28 = vpop.permute.xlu0 %1970 }
 0xc87   : > { %v1976_v26 = vsel %vm1975_vm2, %v1974_v24, %v1967_v25  ;;  %vm3841_vm2 = vmmov %vm3840_vm1 }
 0xc88   : > { %v1977_v27 = vsel %vm3828_vm4, %v1976_v26, 0.0 }
 0xc89   : > { %v1978_v29 = vsel %vm1688_vm11, %v1977_v27, %v1971_v28  ;;  %vm3831_vm11 = vcmask 7168  }
 0xc8a   : > { %v1980_v30 = vsel %vm1979_vm9, %v1978_v29, 0.0  ;;  %vm3832_vm12 = vmmov %vm3831_vm11 }
 0xc8b   : > { %1997 = vrot.lane.b32.xlu0 %v1980_v30, %s3156_s8  ;;  %2003 = vrot.lane.b32.xlu1 %v1980_v30, %s3163_s4  ;;  %vm3838_vm15 = vmmov %vm3831_vm11  ;;  %s3173_s4 = smov 94  }
 0xc8c   : > { %vm3839_vm7 = vmmov %vm3831_vm11 }
 0xc8d   : > { %vm3842_vm9 = vmmov %vm3840_vm1 }
 0xc8e   : > { %vm2688_vm4 = vmpackc.low %vm3842_vm9, %vm3842_vm9 }
 0xc8f   : > { %1991 = vrot.lane.b32.xlu0 %v1980_v30, %s3164_s7  ;;  %2000 = vrot.lane.b32.xlu1 %v1980_v30, %s3165_s1  ;;  %s3829_s1 = sld [smem:[#allocation9_spill]]  ;;  %s3170_s7 = smov 74  }
 0xc93   : > { %1985 = vrot.lane.b32.xlu0 %v1980_v30, %s3805_s9  ;;  %1994 = vrot.lane.b32.xlu1 %v1980_v30, %s3166_s30  ;;  %s3168_s30 = smov 98   ;;  %s3169_s9 = smov 78  }
 0xc95   : > { %v1092_v33 = vld [vmem:[%s3829_s1 + $0x8] sm:$0xff]  ;;  %v1091_v34 = vld [vmem:[%s3829_s1] sm:$0xff] }
 0xc97   : > { %1982 = vrot.lane.b32.xlu0 %v1980_v30, %s3135_s10  ;;  %1988 = vrot.lane.b32.xlu1 %v1980_v30, %s3167_s2 }
 0xc9b   : > { %2022 = vperm.xlu0 %2998, %v2014_v31   ;;  %2017 = vperm.xlu1 %2997, %v2013_v32   ;;  %v2160_v31 = vld [vmem:[%s3781_s17] sm:$0xff] }
 0xc9f   : > { %1100 = vperm.xlu0 %2998, %v1092_v33   ;;  %1095 = vperm.xlu1 %2997, %v1091_v34  }
 0xcfd   : > { %v1998_v35 = vpop.permute.xlu0 %1997  ;;  %v2004_v36 = vpop.permute.xlu1 %2003 }
 0xcfe   : > { %v2012_v37 = vpack.c.bf16 %v2004_v36, %v2004_v36 }
 0xd00   : > { %v2035_v38 = vsel %vm822_vm3, %v2012_v37, 0 }
 0xd01   : > { %v1992_v39 = vpop.permute.xlu0 %1991  ;;  %2871 = vmatpush3.bf16.msra.mxu1 %v2035_v38  ;;  %v2001_v40 = vpop.permute.xlu1 %2000 }
 0xd02   : > { %v2011_v41 = vpack.c.bf16 %v2001_v40, %v1998_v35  ;;  %2872 = vmatprep.subr.bf16.mxu1 %v3131_v1 }
 0xd05   : > { %2873 = vmatpush3.bf16.msra.mxu1 %v2011_v41  ;;  %v1995_v42 = vpop.permute.xlu1 %1994  ;;  %v1986_v43 = vpop.permute.xlu0 %1985 }
 0xd06   : > { %v2010_v18 = vpack.c.bf16 %v1995_v42, %v1992_v39  ;;  %2874 = vmatprep.subr.bf16.mxu1 %v3131_v1 }
 0xd09   : > { %2875 = vmatpush3.bf16.msra.mxu1 %v2010_v18  ;;  %v1989_v46 = vpop.permute.xlu1 %1988  ;;  %v1983_v48 = vpop.permute.xlu0 %1982 }
 0xd0a   : > { %v2009_v47 = vpack.c.bf16 %v1989_v46, %v1986_v43  ;;  %2876 = vmatprep.subr.bf16.mxu1 %v3131_v1  ;;  %v2684_v49 = vpack.c.bf16 %v1983_v48, %v1978_v29  ;;  %v2161_v46 = vld [vmem:[%s3781_s17 + $0x8] sm:$0xff] }
 0xd0d   : > { %2877 = vmatpush3.bf16.msra.mxu1 %v2009_v47 }
 0xd0e   : > { %2878 = vmatprep.subr.bf16.mxu1 %v3131_v1 }
 0xd11   : > { %2879 = vmatpush3.bf16.msk.msra.mxu1 %vm2683_vm6, %v2684_v49  ;;  %vm3843_vm6 = vmmov %vm3839_vm7 }
 0xd12   : > { %2900 = vmatprep.subr.bf16.mxu1 %v3131_v1 }
 0xd14   : > { %2881 = vmatmul.mubr.msk.bf16.vlgmr.msra.gmra.mxu1 %vm2030_vm8, %v3116_v50  ;;  %vm3844_vm8 = vmmov %vm3843_vm6 }
 0xd15   : > { %2902 = vmatprep.mubr.msk.bf16.mxu1 %vm3132_vm0, %v3131_v1 }
 0xd16   : > { %v2023_v51 = vpop.permute.xlu0 %2022  ;;  %v2018_v52 = vpop.permute.xlu1 %2017 }
 0xd1a   : > { %v1101_v53 = vpop.permute.xlu0 %1100  ;;  %v1096_v54 = vpop.permute.xlu1 %1095 }
 0xd1b   : > { %v1153_v59 = vadd.f32 %v3517_v45, %v1101_v53  ;;  %v1150_v3 = vadd.f32 %v3515_v44, %v1096_v54 }
 0xd1d   : > { %v1157_v4 = vmax.f32 %v1153_v59, 0.0  ;;  %v1156_v5 = vmax.f32 %v1150_v3, 0.0 }
 0xd1f   : > { %v3039_v6 = vpack.i.bf16 %v1157_v4, %v1156_v5  ;;  %v3117_v4 = vld [vmem:[%s3780_s16] sm:$0xff]  }
 0xdd4   : > { %v2071_v56 = vpop.f32.mrf.mxu1 }
 0xdd5   : > { %v2072_v57 = vadd.f32 %v2071_v56, %v2018_v52 }
 0xdd6   : > { %v2882_v58 = vpop.f32.mrf.mxu1 }
 0xdd7   : > { %v2078_v62 = vmax.f32 %v2072_v57, 0.0 }
 0xdd8   : > { %v2074_v63 = vpop.f32.mrf.mxu1 }
 0xdd9   : > { %v2075_v0 = vadd.f32 %v2074_v63, %v2023_v51  ;;  %2082 = vrot.lane.b32.xlu1 %v2078_v62, %s3167_s2 }
 0xdda   : > { %v2883_v2 = vpop.f32.mrf.mxu1 }
 0xddb   : > { %v2079_v55 = vmax.f32 %v2075_v0, 0.0  ;;  %v1802_v0 = vadd.f32 %v3548_v61, %v3544_v15 }
 0xddd   : > { %2084 = vrot.lane.b32.xlu0 %v2079_v55, %s3167_s2  ;;  %2090 = vrot.lane.b32.xlu1 %v2078_v62, %s3156_s8  ;;  %s3837_s2 = smov 88  }
 0xde1   : > { %2092 = vrot.lane.b32.xlu0 %v2079_v55, %s3156_s8  ;;  %3040 = vrot.lane.b32.xlu1 %v3039_v6, %s3130_s0  ;;  %s3853_s8 = smov 92  }
 0xe4b   : > { %v2083_v45 = vpop.permute.xlu1 %2082 }
 0xe4c   : > { %v2088_v9 = vadd.f32 %v2083_v45, %v2078_v62 }
 0xe4f   : > { %v2085_v44 = vpop.permute.xlu0 %2084  ;;  %v2091_v8 = vpop.permute.xlu1 %2090 }
 0xe50   : > { %v2089_v11 = vadd.f32 %v2085_v44, %v2079_v55  ;;  %v2096_v13 = vadd.f32 %v2091_v8, %v2088_v9  ;;  %v2223_v9 = vld [vmem:[%s3782_s18] sm:$0x3] }
 0xe52   : > { %v2098_v21 = vmul.f32 0.33333334, %v2096_v13 }
 0xe53   : > { %v2093_v14 = vpop.permute.xlu0 %2092  ;;  %v3041_v16 = vpop.permute.xlu1 %3040 }
 0xe54   : > { %v2097_v17 = vadd.f32 %v2093_v14, %v2089_v11  ;;  %v3043_v19 = vunpack.i.h.bf16 %v3041_v16  ;;  %v3042_v20 = vunpack.i.l.bf16 %v3041_v16  ;;  %v2229_v11 = vsel %vm1237_vm14, %v2223_v9, 0 }
 0xe55   : > { %2901 = vmatpush3.bf16.msra.mxu1 %v2229_v11  ;;  %v1318_v11 = vadd.f32 %v3455_v12, %v3446_v7 }
 0xe56   : > { %v2099_v22 = vmul.f32 0.33333334, %v2097_v17  ;;  %v2119_v24 = vsel %vm3831_vm11, 0.0, %v3043_v19  ;;  %v2118_v25 = vsel %vm3832_vm12, 0.0, %v3042_v20  ;;  %2922 = vmatprep.subr.bf16.mxu1 %v3131_v1  ;;  %vm3845_vm11 = vcmask 72704  }
 0xe57   : > { %v2123_v26 = vsel %vm3833_vm10, %v2119_v24, 0.0  ;;  %v2122_v27 = vsel %vm3834_vm5, %v2118_v25, 0.0  ;;  %v2689_v28 = vpack.c.bf16 %v2119_v24, %v2118_v25  ;;  %vm3846_vm12 = vmmov %vm3845_vm11  ;;  %v2330_v24 = vld [vmem:[%s3784_s20] sm:$0xff]  ;;  %vm2224_vm10 = vcmask 31744  }
 0xe58   : > { %v3044_v29 = vpack.i.bf16 %v2099_v22, %v2098_v21  ;;  %v3049_v30 = vpack.i.bf16 %v2123_v26, %v2122_v27  ;;  %vm3849_vm5 = vmmov %vm3843_vm6 }
 0xe5a   : > { %3045 = vrot.lane.b32.xlu0 %v3044_v29, %s3130_s0  ;;  %3050 = vrot.lane.b32.xlu1 %v3049_v30, %s3835_s6 }
 0xe5e   : > { %3060 = vrot.lane.b32.xlu1 %v3049_v30, %s3135_s10 }
 0xe62   : > { %2164 = vperm.xlu1 %2997, %v2160_v31  }
 0xe66   : > { %1803 = vrot.lane.b32.xlu1 %v3544_v15, %s3836_s5  ;;  %s3854_s5 = smov 56  }
 0xe6a   : > { %1811 = vrot.lane.b32.xlu1 %v3544_v15, %s3837_s2  ;;  %s3855_s2 = smov 20  }
 0xecc   : > { %v3046_v32 = vpop.permute.xlu0 %3045  ;;  %v3051_v33 = vpop.permute.xlu1 %3050 }
 0xecd   : > { %v3048_v34 = vunpack.i.h.bf16 %v3046_v32  ;;  %v3047_v35 = vunpack.i.l.bf16 %v3046_v32  ;;  %v3053_v36 = vunpack.i.h.bf16 %v3051_v33  ;;  %v3052_v37 = vunpack.i.l.bf16 %v3051_v33 }
 0xecf   : > { %v2117_v38 = vsel %vm3838_vm15, 0.0, %v3048_v34  ;;  %v2116_v39 = vsel %vm3839_vm7, 0.0, %v3047_v35  ;;  %v2159_v40 = vpack.c.bf16 %v3053_v36, %v3052_v37  ;;  %vm3850_vm15 = vmmov %vm3849_vm5 }
 0xed0   : > { %v2121_v41 = vsel %vm3840_vm1, %v2117_v38, 0.0  ;;  %v2120_v42 = vsel %vm3841_vm2, %v2116_v39, 0.0  ;;  %v2692_v43 = vpack.c.bf16 %v2117_v38, %v2116_v39  ;;  %v3061_v47 = vpop.permute.xlu1 %3060  ;;  %vm3851_vm7 = vmmov %vm3845_vm11 }
 0xed1   : > { %2885 = vmatpush3.bf16.msra.mxu0 %v2159_v40  ;;  %v3054_v18 = vpack.i.bf16 %v2121_v41, %v2120_v42  ;;  %v3063_v51 = vunpack.i.h.bf16 %v3061_v47  ;;  %v3062_v52 = vunpack.i.l.bf16 %v3061_v47  ;;  %vm3852_vm1 = vmmov %vm3851_vm7 }
 0xed2   : > { %2886 = vmatprep.subr.bf16.mxu0 %v3131_v1  ;;  %vm3856_vm2 = vmmov %vm3852_vm1 }
 0xed3   : > { %3055 = vrot.lane.b32.xlu0 %v3054_v18, %s3835_s6  ;;  %v2157_v56 = vpack.c.bf16 %v3063_v51, %v3062_v52  ;;  %vm2696_vm9 = vmpackc.low %vm3856_vm2, %vm3856_vm2 }
 0xed7   : > { %3065 = vrot.lane.b32.xlu0 %v3054_v18, %s3135_s10 }
 0xedb   : > { %2169 = vperm.xlu0 %2998, %v2161_v46  }
 0xedd   : > { %v2165_v59 = vpop.permute.xlu1 %2164 }
 0xedf   : > { %1807 = vrot.lane.b32.xlu0 %v3544_v15, %s3168_s30  ;;  %s3171_s30 = smov 38  }
 0xee1   : > { %v1804_v62 = vpop.permute.xlu1 %1803 }
 0xee2   : > { %v1806_v2 = vadd.f32 %v1804_v62, %v1802_v0 }
 0xee3   : > { %1815 = vrot.lane.b32.xlu0 %v3544_v15, %s3169_s9  ;;  %s3172_s9 = smov 2  }
 0xee5   : > { %v1812_v6 = vpop.permute.xlu1 %1811 }
 0xf45   : > { %v3056_v48 = vpop.permute.xlu0 %3055 }
 0xf46   : > { %v3058_v49 = vunpack.i.h.bf16 %v3056_v48  ;;  %v3057_v50 = vunpack.i.l.bf16 %v3056_v48 }
 0xf48   : > { %v2158_v53 = vpack.c.bf16 %v3058_v49, %v3057_v50 }
 0xf49   : > { %v3066_v54 = vpop.permute.xlu0 %3065 }
 0xf4a   : > { %2887 = vmatpush3.bf16.msra.mxu0 %v2158_v53  ;;  %v3068_v57 = vunpack.i.h.bf16 %v3066_v54  ;;  %v3067_v58 = vunpack.i.l.bf16 %v3066_v54 }
 0xf4b   : > { %2888 = vmatprep.subr.bf16.mxu0 %v3131_v1 }
 0xf4c   : > { %v2156_v3 = vpack.c.bf16 %v3068_v57, %v3067_v58 }
 0xf4e   : > { %2889 = vmatpush3.bf16.msra.mxu0 %v2157_v56 }
 0xf4f   : > { %2890 = vmatprep.subr.bf16.mxu0 %v3131_v1 }
 0xf52   : > { %2891 = vmatpush3.bf16.msra.mxu0 %v2156_v3 }
 0xf53   : > { %2892 = vmatprep.subr.bf16.mxu0 %v3131_v1 }
 0xf56   : > { %v2170_v63 = vpop.permute.xlu0 %2169  ;;  %2893 = vmatpush3.bf16.msk.msra.mxu0 %vm2688_vm4, %v2689_v28 }
 0xf57   : > { %2894 = vmatprep.subr.bf16.mxu0 %v3131_v1 }
 0xf5a   : > { %v1808_v5 = vpop.permute.xlu0 %1807  ;;  %2895 = vmatpush3.bf16.msk.msra.mxu0 %vm2688_vm4, %v2692_v43  ;;  %vm2382_vm4 = vcmask 64512  }
 0xf5b   : > { %v1810_v55 = vadd.f32 %v1808_v5, %v1806_v2  ;;  %2906 = vmatprep.subr.bf16.mxu0 %v3131_v1  ;;  %v2381_v2 = vld [vmem:[%s3785_s21] sm:$0xf] }
 0xf5d   : > { %2897 = vmatmul.mubr.msk.bf16.vlgmr.msra.gmra.mxu0 %vm2177_vm13, %v3117_v4  ;;  %v1814_v45 = vadd.f32 %v1812_v6, %v1810_v55  ;;  %v2387_v4 = vsel %vm822_vm3, %v2381_v2, 0 }
 0xf5e   : > { %v1816_v44 = vpop.permute.xlu0 %1815  ;;  %2918 = vmatprep.mubr.msk.bf16.mxu0 %vm3132_vm0, %v3131_v1 }
 0xf5f   : > { %v1818_v15 = vadd.f32 %v1816_v44, %v1814_v45 }
 0xf61   : > { %v1819_v61 = vmul.f32 0.16666667, %v1818_v15 }
 0xf63   : > { %v3069_v8 = vpack.i.bf16 %v3409_v60, %v1819_v61 }
 0xf65   : > { %3070 = vrot.lane.b32.xlu1 %v3069_v8, %s3130_s0 }
 0xfd7   : > { %v3071_v13 = vpop.permute.xlu1 %3070 }
 0xfd8   : > { %v3073_v14 = vunpack.i.h.bf16 %v3071_v13  ;;  %v3072_v16 = vunpack.i.l.bf16 %v3071_v13 }
 0xfda   : > { %v3656_v17 = vsel %vm3843_vm6, 0.0, %v3073_v14  ;;  %v3659_v19 = vsel %vm3844_vm8, 0.0, %v3072_v16  ;;  %vm3857_vm6 = vmmov %vm3849_vm5 }
 0xfdb   : > { %v2294_v60 = vsel %vm3845_vm11, %v3656_v17, 0.0  ;;  %v2293_v20 = vsel %vm3846_vm12, %v3659_v19, 0.0  ;;  %v2697_v21 = vpack.c.bf16 %v3656_v17, %v3659_v19  ;;  %vm3858_vm8 = vmmov %vm3849_vm5  ;;  %vm3859_vm11 = vcmask 138240  }
 0xfdc   : > { %v3079_v22 = vpack.i.bf16 %v2294_v60, %v2293_v20  ;;  %vm3860_vm12 = vmmov %vm3859_vm11 }
 0xfde   : > { %3080 = vrot.lane.b32.xlu1 %v3079_v22, %s3835_s6 }
 0xfe2   : > { %3090 = vrot.lane.b32.xlu1 %v3079_v22, %s3135_s10 }
 0xfe6   : > { %2333 = vperm.xlu1 %2997, %v2330_v24  }
 0xfea   : > { %1323 = vrot.lane.b32.xlu1 %v3446_v7, %s3170_s7  ;;  %s3174_s7 = smov 58  }
 0xfee   : > { %1331 = vrot.lane.b32.xlu1 %v3446_v7, %s3171_s30  ;;  %s3862_s30 = sshll.u32 %s3864_s3, 2 }
 0xff2   : > { %1340 = vrot.lane.b32.xlu1 %v3446_v7, %s3172_s9 }
 0xff6   : > { %1348 = vrot.lane.b32.xlu1 %v3448_v10, %s3847_s29 }
 0xffa   : > { %1356 = vrot.lane.b32.xlu1 %v3448_v10, %s3848_s28  ;;  %s803_s28 = scalar_lea.vmem %s3790_s26, %s3862_s30 }
0x101d   : > { %v2215_v25 = vpop.f32.mrf.mxu0 }
0x101e   : > { %v2216_v28 = vadd.f32 %v2215_v25, %v2165_v59 }
0x101f   : > { %v2898_v26 = vpop.f32.mrf.mxu0 }
0x1021   : > { %v2218_v27 = vpop.f32.mrf.mxu0 }
0x1022   : > { %v2219_v29 = vadd.f32 %v2218_v27, %v2170_v63 }
0x1023   : > { %v2899_v30 = vpop.f32.mrf.mxu0 }
0x1024   : > { %v2222_v31 = vpack.c.bf16 %v2219_v29, %v2216_v28 }
0x1026   : > { %2903 = vmatmul.mubr.msk.bf16.vlgmr.msra.gmra.mxu1 %vm2224_vm10, %v2222_v31 }
0x1027   : > { %2924 = vmatprep.mubr.msk.bf16.mxu1 %vm3132_vm0, %v3131_v1  ;;  %2923 = vmatpush3.bf16.msra.mxu1 %v2387_v4 }
0x1028   : > { %2928 = vmatprep.subr.bf16.mxu1 %v3131_v1 }
0x1050   : > { %v3081_v32 = vpop.permute.xlu1 %3080 }
0x1051   : > { %v3083_v33 = vunpack.i.h.bf16 %v3081_v32  ;;  %v3082_v34 = vunpack.i.l.bf16 %v3081_v32 }
0x1053   : > { %v2329_v35 = vpack.c.bf16 %v3083_v33, %v3082_v34 }
0x1054   : > { %v3091_v51 = vpop.permute.xlu1 %3090 }
0x1055   : > { %2907 = vmatpush3.bf16.msra.mxu0 %v2329_v35  ;;  %v3093_v56 = vunpack.i.h.bf16 %v3091_v51  ;;  %v3092_v57 = vunpack.i.l.bf16 %v3091_v51  ;;  %v2429_v35 = vrot.slane %v3360_v23, 4  ;;  %v2515_v51 = vld [vmem:[%s3789_s25] sm:$0x7] }
0x1056   : > { %2908 = vmatprep.subr.bf16.mxu0 %v3131_v1 }
0x1057   : > { %v2327_v3 = vpack.c.bf16 %v3093_v56, %v3092_v57 }
0x1061   : > { %v2334_v5 = vpop.permute.xlu1 %2333 }
0x1065   : > { %v1324_v16 = vpop.permute.xlu1 %1323 }
0x1069   : > { %v1332_v60 = vpop.permute.xlu1 %1331 }
0x106d   : > { %v1341_v24 = vpop.permute.xlu1 %1340 }
0x1071   : > { %v1349_v28 = vpop.permute.xlu1 %1348 }
0x1075   : > { %v1357_v32 = vpop.permute.xlu1 %1356 }
0x10e6   : > { %v2265_v36 = vpop.f32.mrf.mxu1 }
0x10e8   : > { %v2904_v37 = vpop.f32.mrf.mxu1 }
0x10ea   : > { %v2268_v38 = vpop.f32.mrf.mxu1 }
0x10eb   : > { %v3074_v39 = vpack.i.bf16 %v2268_v38, %v2265_v36 }
0x10ec   : > { %v2905_v40 = vpop.f32.mrf.mxu1 }
0x10ed   : > { %3075 = vrot.lane.b32.xlu0 %v3074_v39, %s3130_s0 }
0x115f   : > { %v3076_v41 = vpop.permute.xlu0 %3075 }
0x1160   : > { %v3078_v42 = vunpack.i.h.bf16 %v3076_v41  ;;  %v3077_v43 = vunpack.i.l.bf16 %v3076_v41 }
0x1162   : > { %v2288_v18 = vsel %vm3849_vm5, 0.0, %v3078_v42  ;;  %v2287_v46 = vsel %vm3850_vm15, 0.0, %v3077_v43  ;;  %vm2468_vm15 = vcmask 392192  }
0x1163   : > { %v2292_v47 = vsel %vm3851_vm7, %v2288_v18, 0.0  ;;  %v2291_v48 = vsel %vm3852_vm1, %v2287_v46, 0.0  ;;  %v2700_v49 = vpack.c.bf16 %v2288_v18, %v2287_v46 }
0x1164   : > { %v3084_v50 = vpack.i.bf16 %v2292_v47, %v2291_v48 }
0x1166   : > { %3085 = vrot.lane.b32.xlu0 %v3084_v50, %s3835_s6 }
0x116a   : > { %3095 = vrot.lane.b32.xlu0 %v3084_v50, %s3135_s10 }
0x116e   : > { %1319 = vrot.lane.b32.xlu0 %v3446_v7, %s3853_s8 }
0x1172   : > { %1327 = vrot.lane.b32.xlu0 %v3446_v7, %s3854_s5 }
0x1176   : > { %1335 = vrot.lane.b32.xlu0 %v3446_v7, %s3855_s2 }
0x117a   : > { %1342 = vrot.lane.b32.xlu0 %v3448_v10, %s3172_s9 }
0x117e   : > { %1352 = vrot.lane.b32.xlu0 %v3448_v10, %s3173_s4 }
0x1182   : > { %1360 = vrot.lane.b32.xlu0 %v3448_v10, %s3174_s7  ;;  %v2323_v10 = vld [vmem:[%s3783_s19] sm:$0xf] }
0x11d8   : > { %v3086_v52 = vpop.permute.xlu0 %3085 }
0x11d9   : > { %v3088_v53 = vunpack.i.h.bf16 %v3086_v52  ;;  %v3087_v54 = vunpack.i.l.bf16 %v3086_v52  ;;  %v2462_v52 = vld [vmem:[%s3787_s23] sm:$0xf] }
0x11db   : > { %v2328_v58 = vpack.c.bf16 %v3088_v53, %v3087_v54 }
0x11dc   : > { %v3096_v59 = vpop.permute.xlu0 %3095 }
0x11dd   : > { %2909 = vmatpush3.bf16.msra.mxu0 %v2328_v58  ;;  %v3098_v62 = vunpack.i.h.bf16 %v3096_v59  ;;  %v3097_v63 = vunpack.i.l.bf16 %v3096_v59 }
0x11de   : > { %2910 = vmatprep.subr.bf16.mxu0 %v3131_v1 }
0x11df   : > { %v2326_v0 = vpack.c.bf16 %v3098_v62, %v3097_v63  ;;  %v2458_v63 = vld [vmem:[%s3786_s22] sm:$0x3] }
0x11e0   : > { %v1320_v9 = vpop.permute.xlu0 %1319 }
0x11e1   : > { %2911 = vmatpush3.bf16.msra.mxu0 %v2327_v3  ;;  %v1322_v13 = vadd.f32 %v1320_v9, %v1318_v11 }
0x11e2   : > { %2912 = vmatprep.subr.bf16.mxu0 %v3131_v1 }
0x11e3   : > { %v1326_v17 = vadd.f32 %v1324_v16, %v1322_v13 }
0x11e4   : > { %v1328_v14 = vpop.permute.xlu0 %1327 }
0x11e5   : > { %2913 = vmatpush3.bf16.msra.mxu0 %v2326_v0  ;;  %v1330_v20 = vadd.f32 %v1328_v14, %v1326_v17 }
0x11e6   : > { %2914 = vmatprep.subr.bf16.mxu0 %v3131_v1 }
0x11e8   : > { %v1336_v19 = vpop.permute.xlu0 %1335 }
0x11e9   : > { %2915 = vmatpush3.bf16.msk.msra.mxu0 %vm2696_vm9, %v2697_v21  ;;  %v1334_v21 = vadd.f32 %v1332_v60, %v1330_v20 }
0x11ea   : > { %2916 = vmatprep.subr.bf16.mxu0 %v3131_v1 }
0x11eb   : > { %v1338_v26 = vadd.f32 %v1336_v19, %v1334_v21 }
0x11ec   : > { %v1343_v22 = vpop.permute.xlu0 %1342 }
0x11ed   : > { %2917 = vmatpush3.bf16.msk.msra.mxu0 %vm2696_vm9, %v2700_v49 }
0x11f0   : > { %2919 = vmatmul.mubr.msk.bf16.vlgmr.msra.gmra.mxu0 %vm2177_vm13, %v2323_v10  ;;  %vm1344_vm13 = vcmask 15360   ;;  %v1353_v30 = vpop.permute.xlu0 %1352 }
0x11f1   : > { %v1345_v25 = vsel %vm1344_vm13, %v1341_v24, %v1343_v22 }
0x11f2   : > { %v1347_v27 = vadd.f32 %v1345_v25, %v1338_v26 }
0x11f4   : > { %v1351_v29 = vadd.f32 %v1349_v28, %v1347_v27  ;;  %v1361_v12 = vpop.permute.xlu0 %1360 }
0x11f6   : > { %v1355_v31 = vadd.f32 %v1353_v30, %v1351_v29 }
0x11f8   : > { %v1359_v7 = vadd.f32 %v1357_v32, %v1355_v31 }
0x11fa   : > { %v1363_v33 = vadd.f32 %v1361_v12, %v1359_v7 }
0x11fc   : > { %v1364_v34 = vmul.f32 0.083333336, %v1363_v33 }
0x11fe   : > { %v2431_v37 = vsel %vm822_vm3, %v1364_v34, %v2429_v35  ;;  %vm3861_vm3 = vmmov %vm3859_vm11 }
0x11ff   : > { %vm2704_vm5 = vmpackc.low %vm3861_vm3, %vm3861_vm3 }
0x12b0   : > { %v2373_v55 = vpop.f32.mrf.mxu0 }
0x12b1   : > { %v2374_v6 = vadd.f32 %v2373_v55, %v2334_v5 }
0x12b2   : > { %v2920_v45 = vpop.f32.mrf.mxu0 }
0x12b3   : > { %v2379_v44 = vmax.f32 %v2374_v6, 0.0 }
0x12b4   : > { %v2376_v15 = vpop.f32.mrf.mxu0 }
0x12b5   : > { %v2380_v61 = vpack.c.bf16 %v2379_v44, %v2379_v44  ;;  %v2513_v15 = vld [vmem:[%s3788_s24] sm:$0x3] }
0x12b6   : > { %v2921_v8 = vpop.f32.mrf.mxu0 }
0x12b7   : > { %2925 = vmatmul.mubr.msk.bf16.vlgmr.msra.gmra.mxu1 %vm2382_vm4, %v2380_v61 }
0x12b8   : > { %2934 = vmatprep.mubr.msk.bf16.mxu1 %vm3132_vm0, %v3131_v1 }
0x1377   : > { %v2423_v36 = vpop.f32.mrf.mxu1 }
0x1378   : > { %v3099_v38 = vpack.i.bf16 %v2431_v37, %v2423_v36 }
0x1379   : > { %v2926_v39 = vpop.f32.mrf.mxu1 }
0x137a   : > { %3100 = vrot.lane.b32.xlu1 %v3099_v38, %s3130_s0 }
0x137b   : > { %v2426_v40 = vpop.f32.mrf.mxu1 }
0x137d   : > { %v2927_v41 = vpop.f32.mrf.mxu1 }
0x13ec   : > { %v3101_v42 = vpop.permute.xlu1 %3100 }
0x13ed   : > { %v3103_v43 = vunpack.i.h.bf16 %v3101_v42  ;;  %v3102_v18 = vunpack.i.l.bf16 %v3101_v42 }
0x13ef   : > { %v2441_v46 = vsel %vm3857_vm6, 0.0, %v3103_v43  ;;  %v2440_v47 = vsel %vm3858_vm8, 0.0, %v3102_v18 }
0x13f0   : > { %v2443_v48 = vsel %vm3859_vm11, %v2441_v46, 0.0  ;;  %v2442_v23 = vsel %vm3860_vm12, %v2440_v47, 0.0  ;;  %v2705_v49 = vpack.c.bf16 %v2441_v46, %v2440_v47 }
0x13f1   : > { %v3109_v50 = vpack.i.bf16 %v2443_v48, %v2442_v23 }
0x13f3   : > { %3110 = vrot.lane.b32.xlu1 %v3109_v50, %s3135_s10  ;;  %3105 = vrot.lane.b32.xlu0 %v3109_v50, %s3835_s6 }
0x13f7   : > { %2518 = vperm.xlu1 %2997, %v2515_v51   ;;  %2465 = vperm.xlu0 %2998, %v2462_v52  }
0x1465   : > { %v3111_v53 = vpop.permute.xlu1 %3110  ;;  %v3106_v54 = vpop.permute.xlu0 %3105 }
0x1466   : > { %v3108_v56 = vunpack.i.h.bf16 %v3106_v54  ;;  %v3107_v57 = vunpack.i.l.bf16 %v3106_v54  ;;  %v3113_v58 = vunpack.i.h.bf16 %v3111_v53  ;;  %v3112_v59 = vunpack.i.l.bf16 %v3111_v53 }
0x1468   : > { %v2461_v3 = vpack.c.bf16 %v3108_v56, %v3107_v57  ;;  %v2460_v62 = vpack.c.bf16 %v3113_v58, %v3112_v59 }
0x146a   : > { %2929 = vmatpush3.bf16.msra.mxu1 %v2461_v3 }
0x146b   : > { %2930 = vmatprep.subr.bf16.mxu1 %v3131_v1 }
0x146e   : > { %2931 = vmatpush3.bf16.msra.mxu1 %v2460_v62 }
0x146f   : > { %2932 = vmatprep.subr.bf16.mxu1 %v3131_v1 }
0x1472   : > { %2933 = vmatpush3.bf16.msk.msra.mxu1 %vm2704_vm5, %v2705_v49  ;;  %v2466_v0 = vpop.permute.xlu0 %2465  ;;  %v2519_v61 = vpop.permute.xlu1 %2518 }
0x1473   : > { %2938 = vmatprep.subr.bf16.mxu1 %v3131_v1 }
0x1475   : > { %2935 = vmatmul.mubr.msk.bf16.vlgmr.msra.gmra.mxu1 %vm2468_vm15, %v2458_v63 }
0x1476   : > { %2940 = vmatprep.mubr.msk.bf16.mxu1 %vm3132_vm0, %v3131_v1  ;;  %vm2567_vm0 = vcmask 124928  }
0x1535   : > { %v2506_v10 = vpop.f32.mrf.mxu1 }
0x1536   : > { %v2507_v2 = vadd.f32 %v2506_v10, %v2466_v0 }
0x1537   : > { %v2936_v4 = vpop.f32.mrf.mxu1 }
0x1538   : > { %v2512_v5 = vmax.f32 %v2507_v2, 0.0 }
0x1539   : > { %v2509_v55 = vpop.f32.mrf.mxu1 }
0x153a   : > { %v2514_v6 = vpack.c.bf16 %v2512_v5, %v2512_v5 }
0x153b   : > { %v2937_v45 = vpop.f32.mrf.mxu1 }
0x153c   : > { %v2525_v44 = vsel %vm1237_vm14, %v2514_v6, 0 }
0x153d   : > { %2939 = vmatpush3.bf16.msra.mxu1 %v2525_v44 }
0x1540   : > { %2941 = vmatmul.mubr.msk.bf16.vlgmr.msra.gmra.mxu1 %vm2224_vm10, %v2513_v15 }
0x1600   : > { %v2561_v8 = vpop.f32.mrf.mxu1 }
0x1601   : > { %v2562_v1 = vadd.f32 %v2561_v8, %v2519_v61 }
0x1602   : > { %v2942_v9 = vpop.f32.mrf.mxu1 }
0x1603   : > { %v2568_v11 = vsel %vm2567_vm0, %v2562_v1, -inf }
0x1604   : > { %v2569_v13 = vrot.slane %v2568_v11, 4  ;;  %v2564_v14 = vpop.f32.mrf.mxu1 }
0x1606   : > { %v2570_v16 = vmax.f32 %v2568_v11, %v2569_v13  ;;  %v2943_v17 = vpop.f32.mrf.mxu1 }
0x1608   : > { %v2571_v19 = vrot.slane %v2570_v16, 2 }
0x160a   : > { %v2572_v60 = vmax.f32 %v2570_v16, %v2571_v19 }
0x160c   : > { %v2573_v20 = vrot.slane %v2572_v60, 1 }
0x160e   : > { %v2574_v21 = vmax.f32 %v2572_v60, %v2573_v20 }
0x1610   : > { %v2575_v22 = vsub.f32 %v2562_v1, %v2574_v21 }
0x1612   : > { %v2576_v24 = vmul.f32 1.442695, %v2575_v22 }
0x1614   : > { %3118 = vpow2.f32 %v2576_v24 }
0x1621   : > { %v3119_v25 = vpop.eup %3118 }
0x1622   : > { %v2578_v26 = vsel %vm2567_vm0, %v3119_v25, 0.0 }
0x1623   : > { %v2579_v27 = vrot.slane %v2578_v26, 4 }
0x1625   : > { %v2580_v28 = vadd.f32 %v2579_v27, %v2578_v26 }
0x1627   : > { %v2581_v29 = vrot.slane %v2580_v28, 2 }
0x1629   : > { %v2582_v30 = vadd.f32 %v2581_v29, %v2580_v28 }
0x162b   : > { %v2583_v31 = vrot.slane %v2582_v30, 1 }
0x162d   : > { %v2584_v32 = vadd.f32 %v2583_v31, %v2582_v30 }
0x162f   : > { %3120 = vrcp.f32 %v2584_v32 }
0x163c   : > { %v3121_v7 = vpop.eup %3120 }
0x163d   : > { %v2586_v12 = vmul.f32 %v3121_v7, %v3119_v25 }
0x163f   : > { %2587 = vst.msk [vmem:[%s803_s28] sm:$0x7] %vm2567_vm0, %v2586_v12 }
0x1640 PF: > { %s36_s27 = sadd.s32 1, %s3128_s27  }
0x1641   : > { %p33_p4 = scmp.ge.s32.totalorder %s36_s27, 4  }
0x1643   :  { %35 = sbr.rel (!%p33_p4) target bundleno = 12 (0xc), region = 157 }

</bundles_post_ra>
